<compile_context>
chip_gen: v7x
topology: tpu7x:2x2x1
jax: 0.10.0
libtpu: 0.0.40
codegen_flags: <defaults>
</compile_context>

<pallas_src>
import jax
import jax.numpy as jnp
from jax.experimental import pallas as pl
from jax.experimental.pallas import tpu as pltpu

EPS = 1e-5
MARGIN = 128  # lane margin around the flattened spatial axis (multiple of 128)


# ---------------------------------------------------------------------------
# Fused Pallas kernel
# ---------------------------------------------------------------------------
def _make_fused_kernel(offs, cin_p, cout, M, G, has_downsample):
    """Build the fused residual-block kernel. Everything closed over is static."""

    def kernel(*refs):
        if has_downsample:
            (x_ref, masks_ref, w1_ref, b1_ref, g1_ref, be1_ref,
             w2_ref, b2_ref, g2_ref, be2_ref, wd_ref, bd_ref,
             o_ref, y1s_ref) = refs
        else:
            (x_ref, masks_ref, w1_ref, b1_ref, g1_ref, be1_ref,
             w2_ref, b2_ref, g2_ref, be2_ref,
             o_ref, y1s_ref) = refs

        # ---- conv1: kh*kw shifted reads of the margin-padded input ----------
        acc1 = jnp.zeros((cout, M), jnp.float32)
        for t, off in enumerate(offs):
            xs = x_ref[:, G + off:G + off + M] * masks_ref[t]        # (cin_p, M)
            acc1 = acc1 + jnp.dot(w1_ref[t], xs,
                                  preferred_element_type=jnp.float32)
        y1 = acc1 + b1_ref[...]                                       # (cout, M)

        # ---- bn1 (training-mode batch stats over N*H*W) + relu, all f32 -----
        m1 = jnp.mean(y1, axis=1, keepdims=True)
        v1 = jnp.mean(jnp.square(y1 - m1), axis=1, keepdims=True)     # biased
        y1 = (y1 - m1) * jax.lax.rsqrt(v1 + EPS) * g1_ref[...] + be1_ref[...]
        y1 = jnp.maximum(y1, 0.0)

        # Park y1 in a margin-padded VMEM scratch so conv2's taps are plain
        # static lane-offset slices (the margins stay zero).
        y1s_ref[...] = jnp.zeros((cout, M + 2 * G), jnp.float32)
        y1s_ref[:, G:G + M] = y1

        # ---- conv2 ----------------------------------------------------------
        acc2 = jnp.zeros((cout, M), jnp.float32)
        for t, off in enumerate(offs):
            ys = y1s_ref[:, G + off:G + off + M] * masks_ref[t]       # (cout, M)
            acc2 = acc2 + jnp.dot(w2_ref[t], ys,
                                  preferred_element_type=jnp.float32)
        y2 = acc2 + b2_ref[...]

        # ---- bn2 -------------------------------------------------------------
        m2 = jnp.mean(y2, axis=1, keepdims=True)
        v2 = jnp.mean(jnp.square(y2 - m2), axis=1, keepdims=True)
        y2 = (y2 - m2) * jax.lax.rsqrt(v2 + EPS) * g2_ref[...] + be2_ref[...]

        # ---- identity / 1x1 downsample + residual add + relu (single store) --
        if has_downsample:
            xv = x_ref[:, G:G + M]
            idn = jnp.dot(wd_ref[...], xv,
                          preferred_element_type=jnp.float32) + bd_ref[...]
        else:
            idn = x_ref[0:cout, G:G + M]
        o_ref[...] = jnp.maximum(y2 + idn, 0.0)

    return kernel


# ---------------------------------------------------------------------------
# Wrapper (layout plumbing only)
# ---------------------------------------------------------------------------
def residual_block_forward(x_nchw, params, kernel_size, stride, padding):
    """Forward pass matching the PyTorch ResidualBlock (input/output NCHW)."""
    # TODO(synk): stride > 1 needs non-uniform shifted reads (Ho != H); only
    # stride == 1 is implemented here (the reference config uses stride=1).
    assert stride == 1, "fused kernel currently supports stride == 1 only"

    N, Cin, H, W = x_nchw.shape
    kh = kw = kernel_size
    Cout = params["w1"].shape[-1]
    M = N * H * W
    G = MARGIN
    Cin_p = ((Cin + 7) // 8) * 8          # pad channels up to a full sublane group
    has_ds = Cin != Cout

    # Input: NCHW -> (Cin, N*H*W), channel-pad to Cin_p, add zero lane margins.
    x_t = jnp.transpose(x_nchw.astype(jnp.float32), (1, 0, 2, 3)).reshape(Cin, M)
    x_t = jnp.pad(x_t, ((0, Cin_p - Cin), (G, G)))

    # Per-tap transposed conv weights: (kh*kw, Cout, Cin_p) and (kh*kw, Cout, Cout).
    w1_t = jnp.transpose(params["w1"].astype(jnp.float32),
                         (0, 1, 3, 2)).reshape(kh * kw, Cout, Cin)
    w1_t = jnp.pad(w1_t, ((0, 0), (0, 0), (0, Cin_p - Cin)))
    w2_t = jnp.transpose(params["w2"].astype(jnp.float32),
                         (0, 1, 3, 2)).reshape(kh * kw, Cout, Cout)

    # Tap lane-offsets and validity masks (shared by conv1/conv2: same H, W, pad).
    taps = [(di, dj) for di in range(kh) for dj in range(kw)]
    offs = [(di - padding) * W + (dj - padding) for di, dj in taps]
    hh = jnp.arange(H).reshape(H, 1)
    ww = jnp.arange(W).reshape(1, W)
    mask_list = []
    for di, dj in taps:
        hs, ws = hh + (di - padding), ww + (dj - padding)
        m = ((hs >= 0) & (hs < H) & (ws >= 0) & (ws < W)).astype(jnp.float32)
        mask_list.append(jnp.tile(m.reshape(1, H * W), (1, N)))      # (1, M)
    masks = jnp.stack(mask_list, axis=0)                             # (kh*kw, 1, M)

    col = lambda v: v.astype(jnp.float32).reshape(-1, 1)             # (Cout, 1)
    args = [x_t, masks,
            w1_t, col(params["b1"]), col(params["g1"]), col(params["be1"]),
            w2_t, col(params["b2"]), col(params["g2"]), col(params["be2"])]
    if has_ds:
        wd_t = params["wd"].astype(jnp.float32).reshape(Cin, Cout).T  # (Cout, Cin)
        wd_t = jnp.pad(wd_t, ((0, 0), (0, Cin_p - Cin)))
        args += [wd_t, col(params["bd"])]

    kernel = _make_fused_kernel(offs, Cin_p, Cout, M, G, has_ds)
    out_t = pl.pallas_call(
        kernel,
        out_shape=jax.ShapeDtypeStruct((Cout, M), jnp.float32),
        in_specs=[pl.BlockSpec(memory_space=pltpu.MemorySpace.VMEM)] * len(args),
        out_specs=pl.BlockSpec(memory_space=pltpu.MemorySpace.VMEM),
        scratch_shapes=[pltpu.VMEM((Cout, M + 2 * G), jnp.float32)],
    )(*args)

    # (Cout, N*H*W) -> NCHW
    return jnp.transpose(out_t.reshape(Cout, N, H, W), (1, 0, 2, 3))


# ---------------------------------------------------------------------------
# Pure-JAX reference (NHWC, highest precision) for the correctness check
# ---------------------------------------------------------------------------
def reference_forward(x_nchw, params, kernel_size, stride, padding):
    x = jnp.transpose(x_nchw, (0, 2, 3, 1)).astype(jnp.float32)

    def conv(inp, w, b, pad):
        y = jax.lax.conv_general_dilated(
            inp, w, (stride, stride), [(pad, pad), (pad, pad)],
            dimension_numbers=("NHWC", "HWIO", "NHWC"),
            precision=jax.lax.Precision.HIGHEST)
        return y + b

    def bn(y, g, bta):
        mean = jnp.mean(y, axis=(0, 1, 2), keepdims=True)
        var = jnp.mean(jnp.square(y - mean), axis=(0, 1, 2), keepdims=True)
        return (y - mean) * jax.lax.rsqrt(var + EPS) * g + bta

    out = jnp.maximum(bn(conv(x, params["w1"], params["b1"], padding),
                         params["g1"], params["be1"]), 0.0)
    out = bn(conv(out, params["w2"], params["b2"], padding),
             params["g2"], params["be2"])
    identity = conv(x, params["wd"], params["bd"], 0) if "wd" in params else x
    out = jnp.maximum(out + identity, 0.0)
    return jnp.transpose(out, (0, 3, 1, 2))


# ---------------------------------------------------------------------------
if __name__ == "__main__":
    # ResidualBlock(in_channels=4, out_channels=8, kernel_size=3, stride=1,
    #               padding=1)  -> downsample is a 1x1 conv.
    in_channels, out_channels = 4, 8
    kernel_size, stride, padding = 3, 1, 1
    N, H, W = 2, 16, 16

    key = jax.random.PRNGKey(0)
    kx, k1, k2, k3, kb1, kb2, kb3 = jax.random.split(key, 7)

    x = jax.random.normal(kx, (N, in_channels, H, W), dtype=jnp.float32)  # NCHW

    params = {
        # conv weights stored HWIO (kh, kw, cin, cout)
        "w1": 0.1 * jax.random.normal(k1, (kernel_size, kernel_size, in_channels, out_channels), jnp.float32),
        "b1": 0.1 * jax.random.normal(kb1, (out_channels,), jnp.float32),
        "w2": 0.1 * jax.random.normal(k2, (kernel_size, kernel_size, out_channels, out_channels), jnp.float32),
        "b2": 0.1 * jax.random.normal(kb2, (out_channels,), jnp.float32),
        "wd": 0.1 * jax.random.normal(k3, (1, 1, in_channels, out_channels), jnp.float32),
        "bd": 0.1 * jax.random.normal(kb3, (out_channels,), jnp.float32),
        # BatchNorm affine params: PyTorch default init (gamma=1, beta=0)
        "g1": jnp.ones((out_channels,), jnp.float32),
        "be1": jnp.zeros((out_channels,), jnp.float32),
        "g2": jnp.ones((out_channels,), jnp.float32),
        "be2": jnp.zeros((out_channels,), jnp.float32),
    }

    fwd = jax.jit(residual_block_forward, static_argnums=(2, 3, 4))
    out = jax.block_until_ready(fwd(x, params, kernel_size, stride, padding))

    ref = jax.block_until_ready(
        reference_forward(x, params, kernel_size, stride, padding))
    assert out.shape == (N, out_channels, H, W), out.shape
    # Kernel uses default (single-pass bf16) MXU precision vs a HIGHEST-precision
    # reference; expected rounding is a few e-3 while structural bugs give O(1).
    assert jnp.allclose(out, ref, atol=3e-2, rtol=3e-2), \
        float(jnp.max(jnp.abs(out - ref)))

    print("KERNEL_OK")
</pallas_src>

<mosaic_0001>
module attributes {stable_mosaic.version = 11 : i64} {
  func.func @kernel(%arg0: memref<8x768xf32, #tpu.memory_space<vmem>>, %arg1: memref<9x1x512xf32, #tpu.memory_space<vmem>>, %arg2: memref<9x8x8xf32, #tpu.memory_space<vmem>>, %arg3: memref<8x1xf32, #tpu.memory_space<vmem>>, %arg4: memref<8x1xf32, #tpu.memory_space<vmem>>, %arg5: memref<8x1xf32, #tpu.memory_space<vmem>>, %arg6: memref<9x8x8xf32, #tpu.memory_space<vmem>>, %arg7: memref<8x1xf32, #tpu.memory_space<vmem>>, %arg8: memref<8x1xf32, #tpu.memory_space<vmem>>, %arg9: memref<8x1xf32, #tpu.memory_space<vmem>>, %arg10: memref<8x8xf32, #tpu.memory_space<vmem>>, %arg11: memref<8x1xf32, #tpu.memory_space<vmem>>, %arg12: memref<8x512xf32, #tpu.memory_space<vmem>>, %arg13: memref<8x768xf32, #tpu.memory_space<vmem>>) attributes {dimension_semantics = [], scalar_prefetch = 0 : i64, scratch_operands = 1 : i64, tpu.core_type = #tpu.core_type<tc>} {
    %cst = arith.constant 0.000000e+00 : f32
    %0 = vector.broadcast %cst : f32 to vector<8x512xf32>
    %c0 = arith.constant 0 : index
    %c111 = arith.constant 111 : index
    %1 = vector.load %arg0[%c0, %c111] : memref<8x768xf32, #tpu.memory_space<vmem>>, vector<8x512xf32>
    %c0_0 = arith.constant 0 : index
    %c0_1 = arith.constant 0 : index
    %c0_2 = arith.constant 0 : index
    %2 = vector.load %arg1[%c0_0, %c0_1, %c0_2] : memref<9x1x512xf32, #tpu.memory_space<vmem>>, vector<1x1x512xf32>
    %3 = vector.shape_cast %2 : vector<1x1x512xf32> to vector<1x512xf32>
    %4 = vector.broadcast %3 : vector<1x512xf32> to vector<8x512xf32>
    %5 = arith.mulf %1, %4 : vector<8x512xf32>
    %c0_3 = arith.constant 0 : index
    %c0_4 = arith.constant 0 : index
    %c0_5 = arith.constant 0 : index
    %6 = vector.load %arg2[%c0_3, %c0_4, %c0_5] : memref<9x8x8xf32, #tpu.memory_space<vmem>>, vector<1x8x8xf32>
    %7 = vector.shape_cast %6 : vector<1x8x8xf32> to vector<8x8xf32>
    %cst_6 = arith.constant dense<0.000000e+00> : vector<8x512xf32>
    %8 = tpu.matmul %7, %5, %cst_6 {dimension_numbers = #tpu.dot_dimension_numbers<[1], [0], [0], [1], [0, 0, 1, 1], [], []>} : vector<8x8xf32>, vector<8x512xf32>, vector<8x512xf32> -> vector<8x512xf32>
    %9 = arith.addf %0, %8 : vector<8x512xf32>
    %c0_7 = arith.constant 0 : index
    %c112 = arith.constant 112 : index
    %10 = vector.load %arg0[%c0_7, %c112] : memref<8x768xf32, #tpu.memory_space<vmem>>, vector<8x512xf32>
    %c1 = arith.constant 1 : index
    %c0_8 = arith.constant 0 : index
    %c0_9 = arith.constant 0 : index
    %11 = vector.load %arg1[%c1, %c0_8, %c0_9] : memref<9x1x512xf32, #tpu.memory_space<vmem>>, vector<1x1x512xf32>
    %12 = vector.shape_cast %11 : vector<1x1x512xf32> to vector<1x512xf32>
    %13 = vector.broadcast %12 : vector<1x512xf32> to vector<8x512xf32>
    %14 = arith.mulf %10, %13 : vector<8x512xf32>
    %c1_10 = arith.constant 1 : index
    %c0_11 = arith.constant 0 : index
    %c0_12 = arith.constant 0 : index
    %15 = vector.load %arg2[%c1_10, %c0_11, %c0_12] : memref<9x8x8xf32, #tpu.memory_space<vmem>>, vector<1x8x8xf32>
    %16 = vector.shape_cast %15 : vector<1x8x8xf32> to vector<8x8xf32>
    %cst_13 = arith.constant dense<0.000000e+00> : vector<8x512xf32>
    %17 = tpu.matmul %16, %14, %cst_13 {dimension_numbers = #tpu.dot_dimension_numbers<[1], [0], [0], [1], [0, 0, 1, 1], [], []>} : vector<8x8xf32>, vector<8x512xf32>, vector<8x512xf32> -> vector<8x512xf32>
    %18 = arith.addf %9, %17 : vector<8x512xf32>
    %c0_14 = arith.constant 0 : index
    %c113 = arith.constant 113 : index
    %19 = vector.load %arg0[%c0_14, %c113] : memref<8x768xf32, #tpu.memory_space<vmem>>, vector<8x512xf32>
    %c2 = arith.constant 2 : index
    %c0_15 = arith.constant 0 : index
    %c0_16 = arith.constant 0 : index
    %20 = vector.load %arg1[%c2, %c0_15, %c0_16] : memref<9x1x512xf32, #tpu.memory_space<vmem>>, vector<1x1x512xf32>
    %21 = vector.shape_cast %20 : vector<1x1x512xf32> to vector<1x512xf32>
    %22 = vector.broadcast %21 : vector<1x512xf32> to vector<8x512xf32>
    %23 = arith.mulf %19, %22 : vector<8x512xf32>
    %c2_17 = arith.constant 2 : index
    %c0_18 = arith.constant 0 : index
    %c0_19 = arith.constant 0 : index
    %24 = vector.load %arg2[%c2_17, %c0_18, %c0_19] : memref<9x8x8xf32, #tpu.memory_space<vmem>>, vector<1x8x8xf32>
    %25 = vector.shape_cast %24 : vector<1x8x8xf32> to vector<8x8xf32>
    %cst_20 = arith.constant dense<0.000000e+00> : vector<8x512xf32>
    %26 = tpu.matmul %25, %23, %cst_20 {dimension_numbers = #tpu.dot_dimension_numbers<[1], [0], [0], [1], [0, 0, 1, 1], [], []>} : vector<8x8xf32>, vector<8x512xf32>, vector<8x512xf32> -> vector<8x512xf32>
    %27 = arith.addf %18, %26 : vector<8x512xf32>
    %c0_21 = arith.constant 0 : index
    %c127 = arith.constant 127 : index
    %28 = vector.load %arg0[%c0_21, %c127] : memref<8x768xf32, #tpu.memory_space<vmem>>, vector<8x512xf32>
    %c3 = arith.constant 3 : index
    %c0_22 = arith.constant 0 : index
    %c0_23 = arith.constant 0 : index
    %29 = vector.load %arg1[%c3, %c0_22, %c0_23] : memref<9x1x512xf32, #tpu.memory_space<vmem>>, vector<1x1x512xf32>
    %30 = vector.shape_cast %29 : vector<1x1x512xf32> to vector<1x512xf32>
    %31 = vector.broadcast %30 : vector<1x512xf32> to vector<8x512xf32>
    %32 = arith.mulf %28, %31 : vector<8x512xf32>
    %c3_24 = arith.constant 3 : index
    %c0_25 = arith.constant 0 : index
    %c0_26 = arith.constant 0 : index
    %33 = vector.load %arg2[%c3_24, %c0_25, %c0_26] : memref<9x8x8xf32, #tpu.memory_space<vmem>>, vector<1x8x8xf32>
    %34 = vector.shape_cast %33 : vector<1x8x8xf32> to vector<8x8xf32>
    %cst_27 = arith.constant dense<0.000000e+00> : vector<8x512xf32>
    %35 = tpu.matmul %34, %32, %cst_27 {dimension_numbers = #tpu.dot_dimension_numbers<[1], [0], [0], [1], [0, 0, 1, 1], [], []>} : vector<8x8xf32>, vector<8x512xf32>, vector<8x512xf32> -> vector<8x512xf32>
    %36 = arith.addf %27, %35 : vector<8x512xf32>
    %c0_28 = arith.constant 0 : index
    %c128 = arith.constant 128 : index
    %37 = vector.load %arg0[%c0_28, %c128] : memref<8x768xf32, #tpu.memory_space<vmem>>, vector<8x512xf32>
    %c4 = arith.constant 4 : index
    %c0_29 = arith.constant 0 : index
    %c0_30 = arith.constant 0 : index
    %38 = vector.load %arg1[%c4, %c0_29, %c0_30] : memref<9x1x512xf32, #tpu.memory_space<vmem>>, vector<1x1x512xf32>
    %39 = vector.shape_cast %38 : vector<1x1x512xf32> to vector<1x512xf32>
    %40 = vector.broadcast %39 : vector<1x512xf32> to vector<8x512xf32>
    %41 = arith.mulf %37, %40 : vector<8x512xf32>
    %c4_31 = arith.constant 4 : index
    %c0_32 = arith.constant 0 : index
    %c0_33 = arith.constant 0 : index
    %42 = vector.load %arg2[%c4_31, %c0_32, %c0_33] : memref<9x8x8xf32, #tpu.memory_space<vmem>>, vector<1x8x8xf32>
    %43 = vector.shape_cast %42 : vector<1x8x8xf32> to vector<8x8xf32>
    %cst_34 = arith.constant dense<0.000000e+00> : vector<8x512xf32>
    %44 = tpu.matmul %43, %41, %cst_34 {dimension_numbers = #tpu.dot_dimension_numbers<[1], [0], [0], [1], [0, 0, 1, 1], [], []>} : vector<8x8xf32>, vector<8x512xf32>, vector<8x512xf32> -> vector<8x512xf32>
    %45 = arith.addf %36, %44 : vector<8x512xf32>
    %c0_35 = arith.constant 0 : index
    %c129 = arith.constant 129 : index
    %46 = vector.load %arg0[%c0_35, %c129] : memref<8x768xf32, #tpu.memory_space<vmem>>, vector<8x512xf32>
    %c5 = arith.constant 5 : index
    %c0_36 = arith.constant 0 : index
    %c0_37 = arith.constant 0 : index
    %47 = vector.load %arg1[%c5, %c0_36, %c0_37] : memref<9x1x512xf32, #tpu.memory_space<vmem>>, vector<1x1x512xf32>
    %48 = vector.shape_cast %47 : vector<1x1x512xf32> to vector<1x512xf32>
    %49 = vector.broadcast %48 : vector<1x512xf32> to vector<8x512xf32>
    %50 = arith.mulf %46, %49 : vector<8x512xf32>
    %c5_38 = arith.constant 5 : index
    %c0_39 = arith.constant 0 : index
    %c0_40 = arith.constant 0 : index
    %51 = vector.load %arg2[%c5_38, %c0_39, %c0_40] : memref<9x8x8xf32, #tpu.memory_space<vmem>>, vector<1x8x8xf32>
    %52 = vector.shape_cast %51 : vector<1x8x8xf32> to vector<8x8xf32>
    %cst_41 = arith.constant dense<0.000000e+00> : vector<8x512xf32>
    %53 = tpu.matmul %52, %50, %cst_41 {dimension_numbers = #tpu.dot_dimension_numbers<[1], [0], [0], [1], [0, 0, 1, 1], [], []>} : vector<8x8xf32>, vector<8x512xf32>, vector<8x512xf32> -> vector<8x512xf32>
    %54 = arith.addf %45, %53 : vector<8x512xf32>
    %c0_42 = arith.constant 0 : index
    %c143 = arith.constant 143 : index
    %55 = vector.load %arg0[%c0_42, %c143] : memref<8x768xf32, #tpu.memory_space<vmem>>, vector<8x512xf32>
    %c6 = arith.constant 6 : index
    %c0_43 = arith.constant 0 : index
    %c0_44 = arith.constant 0 : index
    %56 = vector.load %arg1[%c6, %c0_43, %c0_44] : memref<9x1x512xf32, #tpu.memory_space<vmem>>, vector<1x1x512xf32>
    %57 = vector.shape_cast %56 : vector<1x1x512xf32> to vector<1x512xf32>
    %58 = vector.broadcast %57 : vector<1x512xf32> to vector<8x512xf32>
    %59 = arith.mulf %55, %58 : vector<8x512xf32>
    %c6_45 = arith.constant 6 : index
    %c0_46 = arith.constant 0 : index
    %c0_47 = arith.constant 0 : index
    %60 = vector.load %arg2[%c6_45, %c0_46, %c0_47] : memref<9x8x8xf32, #tpu.memory_space<vmem>>, vector<1x8x8xf32>
    %61 = vector.shape_cast %60 : vector<1x8x8xf32> to vector<8x8xf32>
    %cst_48 = arith.constant dense<0.000000e+00> : vector<8x512xf32>
    %62 = tpu.matmul %61, %59, %cst_48 {dimension_numbers = #tpu.dot_dimension_numbers<[1], [0], [0], [1], [0, 0, 1, 1], [], []>} : vector<8x8xf32>, vector<8x512xf32>, vector<8x512xf32> -> vector<8x512xf32>
    %63 = arith.addf %54, %62 : vector<8x512xf32>
    %c0_49 = arith.constant 0 : index
    %c144 = arith.constant 144 : index
    %64 = vector.load %arg0[%c0_49, %c144] : memref<8x768xf32, #tpu.memory_space<vmem>>, vector<8x512xf32>
    %c7 = arith.constant 7 : index
    %c0_50 = arith.constant 0 : index
    %c0_51 = arith.constant 0 : index
    %65 = vector.load %arg1[%c7, %c0_50, %c0_51] : memref<9x1x512xf32, #tpu.memory_space<vmem>>, vector<1x1x512xf32>
    %66 = vector.shape_cast %65 : vector<1x1x512xf32> to vector<1x512xf32>
    %67 = vector.broadcast %66 : vector<1x512xf32> to vector<8x512xf32>
    %68 = arith.mulf %64, %67 : vector<8x512xf32>
    %c7_52 = arith.constant 7 : index
    %c0_53 = arith.constant 0 : index
    %c0_54 = arith.constant 0 : index
    %69 = vector.load %arg2[%c7_52, %c0_53, %c0_54] : memref<9x8x8xf32, #tpu.memory_space<vmem>>, vector<1x8x8xf32>
    %70 = vector.shape_cast %69 : vector<1x8x8xf32> to vector<8x8xf32>
    %cst_55 = arith.constant dense<0.000000e+00> : vector<8x512xf32>
    %71 = tpu.matmul %70, %68, %cst_55 {dimension_numbers = #tpu.dot_dimension_numbers<[1], [0], [0], [1], [0, 0, 1, 1], [], []>} : vector<8x8xf32>, vector<8x512xf32>, vector<8x512xf32> -> vector<8x512xf32>
    %72 = arith.addf %63, %71 : vector<8x512xf32>
    %c0_56 = arith.constant 0 : index
    %c145 = arith.constant 145 : index
    %73 = vector.load %arg0[%c0_56, %c145] : memref<8x768xf32, #tpu.memory_space<vmem>>, vector<8x512xf32>
    %c8 = arith.constant 8 : index
    %c0_57 = arith.constant 0 : index
    %c0_58 = arith.constant 0 : index
    %74 = vector.load %arg1[%c8, %c0_57, %c0_58] : memref<9x1x512xf32, #tpu.memory_space<vmem>>, vector<1x1x512xf32>
    %75 = vector.shape_cast %74 : vector<1x1x512xf32> to vector<1x512xf32>
    %76 = vector.broadcast %75 : vector<1x512xf32> to vector<8x512xf32>
    %77 = arith.mulf %73, %76 : vector<8x512xf32>
    %c8_59 = arith.constant 8 : index
    %c0_60 = arith.constant 0 : index
    %c0_61 = arith.constant 0 : index
    %78 = vector.load %arg2[%c8_59, %c0_60, %c0_61] : memref<9x8x8xf32, #tpu.memory_space<vmem>>, vector<1x8x8xf32>
    %79 = vector.shape_cast %78 : vector<1x8x8xf32> to vector<8x8xf32>
    %cst_62 = arith.constant dense<0.000000e+00> : vector<8x512xf32>
    %80 = tpu.matmul %79, %77, %cst_62 {dimension_numbers = #tpu.dot_dimension_numbers<[1], [0], [0], [1], [0, 0, 1, 1], [], []>} : vector<8x8xf32>, vector<8x512xf32>, vector<8x512xf32> -> vector<8x512xf32>
    %81 = arith.addf %72, %80 : vector<8x512xf32>
    %c0_63 = arith.constant 0 : index
    %c0_64 = arith.constant 0 : index
    %82 = vector.load %arg3[%c0_63, %c0_64] : memref<8x1xf32, #tpu.memory_space<vmem>>, vector<8x1xf32>
    %83 = vector.broadcast %82 : vector<8x1xf32> to vector<8x512xf32>
    %84 = arith.addf %81, %83 : vector<8x512xf32>
    %cst_65 = arith.constant dense<0.000000e+00> : vector<8xf32>
    %85 = vector.multi_reduction <add>, %84, %cst_65 [1] : vector<8x512xf32> to vector<8xf32>
    %86 = vector.shape_cast %85 : vector<8xf32> to vector<8x1xf32>
    %cst_66 = arith.constant 5.120000e+02 : f32
    %87 = vector.broadcast %cst_66 : f32 to vector<8x1xf32>
    %88 = arith.divf %86, %87 : vector<8x1xf32>
    %89 = vector.broadcast %88 : vector<8x1xf32> to vector<8x512xf32>
    %90 = arith.subf %84, %89 : vector<8x512xf32>
    %91 = arith.mulf %90, %90 : vector<8x512xf32>
    %cst_67 = arith.constant dense<0.000000e+00> : vector<8xf32>
    %92 = vector.multi_reduction <add>, %91, %cst_67 [1] : vector<8x512xf32> to vector<8xf32>
    %93 = vector.shape_cast %92 : vector<8xf32> to vector<8x1xf32>
    %cst_68 = arith.constant 5.120000e+02 : f32
    %94 = vector.broadcast %cst_68 : f32 to vector<8x1xf32>
    %95 = arith.divf %93, %94 : vector<8x1xf32>
    %96 = vector.broadcast %88 : vector<8x1xf32> to vector<8x512xf32>
    %97 = arith.subf %84, %96 : vector<8x512xf32>
    %cst_69 = arith.constant 9.99999974E-6 : f32
    %98 = vector.broadcast %cst_69 : f32 to vector<8x1xf32>
    %99 = arith.addf %95, %98 : vector<8x1xf32>
    %100 = math.rsqrt %99 : vector<8x1xf32>
    %101 = vector.broadcast %100 : vector<8x1xf32> to vector<8x512xf32>
    %102 = arith.mulf %97, %101 : vector<8x512xf32>
    %c0_70 = arith.constant 0 : index
    %c0_71 = arith.constant 0 : index
    %103 = vector.load %arg4[%c0_70, %c0_71] : memref<8x1xf32, #tpu.memory_space<vmem>>, vector<8x1xf32>
    %104 = vector.broadcast %103 : vector<8x1xf32> to vector<8x512xf32>
    %105 = arith.mulf %102, %104 : vector<8x512xf32>
    %c0_72 = arith.constant 0 : index
    %c0_73 = arith.constant 0 : index
    %106 = vector.load %arg5[%c0_72, %c0_73] : memref<8x1xf32, #tpu.memory_space<vmem>>, vector<8x1xf32>
    %107 = vector.broadcast %106 : vector<8x1xf32> to vector<8x512xf32>
    %108 = arith.addf %105, %107 : vector<8x512xf32>
    %cst_74 = arith.constant 0.000000e+00 : f32
    %109 = vector.broadcast %cst_74 : f32 to vector<8x512xf32>
    %110 = arith.maximumf %108, %109 : vector<8x512xf32>
    %cst_75 = arith.constant 0.000000e+00 : f32
    %111 = vector.broadcast %cst_75 : f32 to vector<8x768xf32>
    %c0_76 = arith.constant 0 : index
    %c0_77 = arith.constant 0 : index
    %112 = vector.load %arg13[%c0_76, %c0_77] : memref<8x768xf32, #tpu.memory_space<vmem>>, vector<8x768xf32>
    tpu.vector_store %arg13[%c0_76, %c0_77], %111 {strides = array<i32>} : memref<8x768xf32, #tpu.memory_space<vmem>>, vector<8x768xf32>,
    %c0_78 = arith.constant 0 : index
    %c128_79 = arith.constant 128 : index
    %113 = vector.load %arg13[%c0_78, %c128_79] : memref<8x768xf32, #tpu.memory_space<vmem>>, vector<8x512xf32>
    tpu.vector_store %arg13[%c0_78, %c128_79], %110 {strides = array<i32>} : memref<8x768xf32, #tpu.memory_space<vmem>>, vector<8x512xf32>,
    %cst_80 = arith.constant 0.000000e+00 : f32
    %114 = vector.broadcast %cst_80 : f32 to vector<8x512xf32>
    %c0_81 = arith.constant 0 : index
    %c111_82 = arith.constant 111 : index
    %115 = vector.load %arg13[%c0_81, %c111_82] : memref<8x768xf32, #tpu.memory_space<vmem>>, vector<8x512xf32>
    %c0_83 = arith.constant 0 : index
    %c0_84 = arith.constant 0 : index
    %c0_85 = arith.constant 0 : index
    %116 = vector.load %arg1[%c0_83, %c0_84, %c0_85] : memref<9x1x512xf32, #tpu.memory_space<vmem>>, vector<1x1x512xf32>
    %117 = vector.shape_cast %116 : vector<1x1x512xf32> to vector<1x512xf32>
    %118 = vector.broadcast %117 : vector<1x512xf32> to vector<8x512xf32>
    %119 = arith.mulf %115, %118 : vector<8x512xf32>
    %c0_86 = arith.constant 0 : index
    %c0_87 = arith.constant 0 : index
    %c0_88 = arith.constant 0 : index
    %120 = vector.load %arg6[%c0_86, %c0_87, %c0_88] : memref<9x8x8xf32, #tpu.memory_space<vmem>>, vector<1x8x8xf32>
    %121 = vector.shape_cast %120 : vector<1x8x8xf32> to vector<8x8xf32>
    %cst_89 = arith.constant dense<0.000000e+00> : vector<8x512xf32>
    %122 = tpu.matmul %121, %119, %cst_89 {dimension_numbers = #tpu.dot_dimension_numbers<[1], [0], [0], [1], [0, 0, 1, 1], [], []>} : vector<8x8xf32>, vector<8x512xf32>, vector<8x512xf32> -> vector<8x512xf32>
    %123 = arith.addf %114, %122 : vector<8x512xf32>
    %c0_90 = arith.constant 0 : index
    %c112_91 = arith.constant 112 : index
    %124 = vector.load %arg13[%c0_90, %c112_91] : memref<8x768xf32, #tpu.memory_space<vmem>>, vector<8x512xf32>
    %c1_92 = arith.constant 1 : index
    %c0_93 = arith.constant 0 : index
    %c0_94 = arith.constant 0 : index
    %125 = vector.load %arg1[%c1_92, %c0_93, %c0_94] : memref<9x1x512xf32, #tpu.memory_space<vmem>>, vector<1x1x512xf32>
    %126 = vector.shape_cast %125 : vector<1x1x512xf32> to vector<1x512xf32>
    %127 = vector.broadcast %126 : vector<1x512xf32> to vector<8x512xf32>
    %128 = arith.mulf %124, %127 : vector<8x512xf32>
    %c1_95 = arith.constant 1 : index
    %c0_96 = arith.constant 0 : index
    %c0_97 = arith.constant 0 : index
    %129 = vector.load %arg6[%c1_95, %c0_96, %c0_97] : memref<9x8x8xf32, #tpu.memory_space<vmem>>, vector<1x8x8xf32>
    %130 = vector.shape_cast %129 : vector<1x8x8xf32> to vector<8x8xf32>
    %cst_98 = arith.constant dense<0.000000e+00> : vector<8x512xf32>
    %131 = tpu.matmul %130, %128, %cst_98 {dimension_numbers = #tpu.dot_dimension_numbers<[1], [0], [0], [1], [0, 0, 1, 1], [], []>} : vector<8x8xf32>, vector<8x512xf32>, vector<8x512xf32> -> vector<8x512xf32>
    %132 = arith.addf %123, %131 : vector<8x512xf32>
    %c0_99 = arith.constant 0 : index
    %c113_100 = arith.constant 113 : index
    %133 = vector.load %arg13[%c0_99, %c113_100] : memref<8x768xf32, #tpu.memory_space<vmem>>, vector<8x512xf32>
    %c2_101 = arith.constant 2 : index
    %c0_102 = arith.constant 0 : index
    %c0_103 = arith.constant 0 : index
    %134 = vector.load %arg1[%c2_101, %c0_102, %c0_103] : memref<9x1x512xf32, #tpu.memory_space<vmem>>, vector<1x1x512xf32>
    %135 = vector.shape_cast %134 : vector<1x1x512xf32> to vector<1x512xf32>
    %136 = vector.broadcast %135 : vector<1x512xf32> to vector<8x512xf32>
    %137 = arith.mulf %133, %136 : vector<8x512xf32>
    %c2_104 = arith.constant 2 : index
    %c0_105 = arith.constant 0 : index
    %c0_106 = arith.constant 0 : index
    %138 = vector.load %arg6[%c2_104, %c0_105, %c0_106] : memref<9x8x8xf32, #tpu.memory_space<vmem>>, vector<1x8x8xf32>
    %139 = vector.shape_cast %138 : vector<1x8x8xf32> to vector<8x8xf32>
    %cst_107 = arith.constant dense<0.000000e+00> : vector<8x512xf32>
    %140 = tpu.matmul %139, %137, %cst_107 {dimension_numbers = #tpu.dot_dimension_numbers<[1], [0], [0], [1], [0, 0, 1, 1], [], []>} : vector<8x8xf32>, vector<8x512xf32>, vector<8x512xf32> -> vector<8x512xf32>
    %141 = arith.addf %132, %140 : vector<8x512xf32>
    %c0_108 = arith.constant 0 : index
    %c127_109 = arith.constant 127 : index
    %142 = vector.load %arg13[%c0_108, %c127_109] : memref<8x768xf32, #tpu.memory_space<vmem>>, vector<8x512xf32>
    %c3_110 = arith.constant 3 : index
    %c0_111 = arith.constant 0 : index
    %c0_112 = arith.constant 0 : index
    %143 = vector.load %arg1[%c3_110, %c0_111, %c0_112] : memref<9x1x512xf32, #tpu.memory_space<vmem>>, vector<1x1x512xf32>
    %144 = vector.shape_cast %143 : vector<1x1x512xf32> to vector<1x512xf32>
    %145 = vector.broadcast %144 : vector<1x512xf32> to vector<8x512xf32>
    %146 = arith.mulf %142, %145 : vector<8x512xf32>
    %c3_113 = arith.constant 3 : index
    %c0_114 = arith.constant 0 : index
    %c0_115 = arith.constant 0 : index
    %147 = vector.load %arg6[%c3_113, %c0_114, %c0_115] : memref<9x8x8xf32, #tpu.memory_space<vmem>>, vector<1x8x8xf32>
    %148 = vector.shape_cast %147 : vector<1x8x8xf32> to vector<8x8xf32>
    %cst_116 = arith.constant dense<0.000000e+00> : vector<8x512xf32>
    %149 = tpu.matmul %148, %146, %cst_116 {dimension_numbers = #tpu.dot_dimension_numbers<[1], [0], [0], [1], [0, 0, 1, 1], [], []>} : vector<8x8xf32>, vector<8x512xf32>, vector<8x512xf32> -> vector<8x512xf32>
    %150 = arith.addf %141, %149 : vector<8x512xf32>
    %c0_117 = arith.constant 0 : index
    %c128_118 = arith.constant 128 : index
    %151 = vector.load %arg13[%c0_117, %c128_118] : memref<8x768xf32, #tpu.memory_space<vmem>>, vector<8x512xf32>
    %c4_119 = arith.constant 4 : index
    %c0_120 = arith.constant 0 : index
    %c0_121 = arith.constant 0 : index
    %152 = vector.load %arg1[%c4_119, %c0_120, %c0_121] : memref<9x1x512xf32, #tpu.memory_space<vmem>>, vector<1x1x512xf32>
    %153 = vector.shape_cast %152 : vector<1x1x512xf32> to vector<1x512xf32>
    %154 = vector.broadcast %153 : vector<1x512xf32> to vector<8x512xf32>
    %155 = arith.mulf %151, %154 : vector<8x512xf32>
    %c4_122 = arith.constant 4 : index
    %c0_123 = arith.constant 0 : index
    %c0_124 = arith.constant 0 : index
    %156 = vector.load %arg6[%c4_122, %c0_123, %c0_124] : memref<9x8x8xf32, #tpu.memory_space<vmem>>, vector<1x8x8xf32>
    %157 = vector.shape_cast %156 : vector<1x8x8xf32> to vector<8x8xf32>
    %cst_125 = arith.constant dense<0.000000e+00> : vector<8x512xf32>
    %158 = tpu.matmul %157, %155, %cst_125 {dimension_numbers = #tpu.dot_dimension_numbers<[1], [0], [0], [1], [0, 0, 1, 1], [], []>} : vector<8x8xf32>, vector<8x512xf32>, vector<8x512xf32> -> vector<8x512xf32>
    %159 = arith.addf %150, %158 : vector<8x512xf32>
    %c0_126 = arith.constant 0 : index
    %c129_127 = arith.constant 129 : index
    %160 = vector.load %arg13[%c0_126, %c129_127] : memref<8x768xf32, #tpu.memory_space<vmem>>, vector<8x512xf32>
    %c5_128 = arith.constant 5 : index
    %c0_129 = arith.constant 0 : index
    %c0_130 = arith.constant 0 : index
    %161 = vector.load %arg1[%c5_128, %c0_129, %c0_130] : memref<9x1x512xf32, #tpu.memory_space<vmem>>, vector<1x1x512xf32>
    %162 = vector.shape_cast %161 : vector<1x1x512xf32> to vector<1x512xf32>
    %163 = vector.broadcast %162 : vector<1x512xf32> to vector<8x512xf32>
    %164 = arith.mulf %160, %163 : vector<8x512xf32>
    %c5_131 = arith.constant 5 : index
    %c0_132 = arith.constant 0 : index
    %c0_133 = arith.constant 0 : index
    %165 = vector.load %arg6[%c5_131, %c0_132, %c0_133] : memref<9x8x8xf32, #tpu.memory_space<vmem>>, vector<1x8x8xf32>
    %166 = vector.shape_cast %165 : vector<1x8x8xf32> to vector<8x8xf32>
    %cst_134 = arith.constant dense<0.000000e+00> : vector<8x512xf32>
    %167 = tpu.matmul %166, %164, %cst_134 {dimension_numbers = #tpu.dot_dimension_numbers<[1], [0], [0], [1], [0, 0, 1, 1], [], []>} : vector<8x8xf32>, vector<8x512xf32>, vector<8x512xf32> -> vector<8x512xf32>
    %168 = arith.addf %159, %167 : vector<8x512xf32>
    %c0_135 = arith.constant 0 : index
    %c143_136 = arith.constant 143 : index
    %169 = vector.load %arg13[%c0_135, %c143_136] : memref<8x768xf32, #tpu.memory_space<vmem>>, vector<8x512xf32>
    %c6_137 = arith.constant 6 : index
    %c0_138 = arith.constant 0 : index
    %c0_139 = arith.constant 0 : index
    %170 = vector.load %arg1[%c6_137, %c0_138, %c0_139] : memref<9x1x512xf32, #tpu.memory_space<vmem>>, vector<1x1x512xf32>
    %171 = vector.shape_cast %170 : vector<1x1x512xf32> to vector<1x512xf32>
    %172 = vector.broadcast %171 : vector<1x512xf32> to vector<8x512xf32>
    %173 = arith.mulf %169, %172 : vector<8x512xf32>
    %c6_140 = arith.constant 6 : index
    %c0_141 = arith.constant 0 : index
    %c0_142 = arith.constant 0 : index
    %174 = vector.load %arg6[%c6_140, %c0_141, %c0_142] : memref<9x8x8xf32, #tpu.memory_space<vmem>>, vector<1x8x8xf32>
    %175 = vector.shape_cast %174 : vector<1x8x8xf32> to vector<8x8xf32>
    %cst_143 = arith.constant dense<0.000000e+00> : vector<8x512xf32>
    %176 = tpu.matmul %175, %173, %cst_143 {dimension_numbers = #tpu.dot_dimension_numbers<[1], [0], [0], [1], [0, 0, 1, 1], [], []>} : vector<8x8xf32>, vector<8x512xf32>, vector<8x512xf32> -> vector<8x512xf32>
    %177 = arith.addf %168, %176 : vector<8x512xf32>
    %c0_144 = arith.constant 0 : index
    %c144_145 = arith.constant 144 : index
    %178 = vector.load %arg13[%c0_144, %c144_145] : memref<8x768xf32, #tpu.memory_space<vmem>>, vector<8x512xf32>
    %c7_146 = arith.constant 7 : index
    %c0_147 = arith.constant 0 : index
    %c0_148 = arith.constant 0 : index
    %179 = vector.load %arg1[%c7_146, %c0_147, %c0_148] : memref<9x1x512xf32, #tpu.memory_space<vmem>>, vector<1x1x512xf32>
    %180 = vector.shape_cast %179 : vector<1x1x512xf32> to vector<1x512xf32>
    %181 = vector.broadcast %180 : vector<1x512xf32> to vector<8x512xf32>
    %182 = arith.mulf %178, %181 : vector<8x512xf32>
    %c7_149 = arith.constant 7 : index
    %c0_150 = arith.constant 0 : index
    %c0_151 = arith.constant 0 : index
    %183 = vector.load %arg6[%c7_149, %c0_150, %c0_151] : memref<9x8x8xf32, #tpu.memory_space<vmem>>, vector<1x8x8xf32>
    %184 = vector.shape_cast %183 : vector<1x8x8xf32> to vector<8x8xf32>
    %cst_152 = arith.constant dense<0.000000e+00> : vector<8x512xf32>
    %185 = tpu.matmul %184, %182, %cst_152 {dimension_numbers = #tpu.dot_dimension_numbers<[1], [0], [0], [1], [0, 0, 1, 1], [], []>} : vector<8x8xf32>, vector<8x512xf32>, vector<8x512xf32> -> vector<8x512xf32>
    %186 = arith.addf %177, %185 : vector<8x512xf32>
    %c0_153 = arith.constant 0 : index
    %c145_154 = arith.constant 145 : index
    %187 = vector.load %arg13[%c0_153, %c145_154] : memref<8x768xf32, #tpu.memory_space<vmem>>, vector<8x512xf32>
    %c8_155 = arith.constant 8 : index
    %c0_156 = arith.constant 0 : index
    %c0_157 = arith.constant 0 : index
    %188 = vector.load %arg1[%c8_155, %c0_156, %c0_157] : memref<9x1x512xf32, #tpu.memory_space<vmem>>, vector<1x1x512xf32>
    %189 = vector.shape_cast %188 : vector<1x1x512xf32> to vector<1x512xf32>
    %190 = vector.broadcast %189 : vector<1x512xf32> to vector<8x512xf32>
    %191 = arith.mulf %187, %190 : vector<8x512xf32>
    %c8_158 = arith.constant 8 : index
    %c0_159 = arith.constant 0 : index
    %c0_160 = arith.constant 0 : index
    %192 = vector.load %arg6[%c8_158, %c0_159, %c0_160] : memref<9x8x8xf32, #tpu.memory_space<vmem>>, vector<1x8x8xf32>
    %193 = vector.shape_cast %192 : vector<1x8x8xf32> to vector<8x8xf32>
    %cst_161 = arith.constant dense<0.000000e+00> : vector<8x512xf32>
    %194 = tpu.matmul %193, %191, %cst_161 {dimension_numbers = #tpu.dot_dimension_numbers<[1], [0], [0], [1], [0, 0, 1, 1], [], []>} : vector<8x8xf32>, vector<8x512xf32>, vector<8x512xf32> -> vector<8x512xf32>
    %195 = arith.addf %186, %194 : vector<8x512xf32>
    %c0_162 = arith.constant 0 : index
    %c0_163 = arith.constant 0 : index
    %196 = vector.load %arg7[%c0_162, %c0_163] : memref<8x1xf32, #tpu.memory_space<vmem>>, vector<8x1xf32>
    %197 = vector.broadcast %196 : vector<8x1xf32> to vector<8x512xf32>
    %198 = arith.addf %195, %197 : vector<8x512xf32>
    %cst_164 = arith.constant dense<0.000000e+00> : vector<8xf32>
    %199 = vector.multi_reduction <add>, %198, %cst_164 [1] : vector<8x512xf32> to vector<8xf32>
    %200 = vector.shape_cast %199 : vector<8xf32> to vector<8x1xf32>
    %cst_165 = arith.constant 5.120000e+02 : f32
    %201 = vector.broadcast %cst_165 : f32 to vector<8x1xf32>
    %202 = arith.divf %200, %201 : vector<8x1xf32>
    %203 = vector.broadcast %202 : vector<8x1xf32> to vector<8x512xf32>
    %204 = arith.subf %198, %203 : vector<8x512xf32>
    %205 = arith.mulf %204, %204 : vector<8x512xf32>
    %cst_166 = arith.constant dense<0.000000e+00> : vector<8xf32>
    %206 = vector.multi_reduction <add>, %205, %cst_166 [1] : vector<8x512xf32> to vector<8xf32>
    %207 = vector.shape_cast %206 : vector<8xf32> to vector<8x1xf32>
    %cst_167 = arith.constant 5.120000e+02 : f32
    %208 = vector.broadcast %cst_167 : f32 to vector<8x1xf32>
    %209 = arith.divf %207, %208 : vector<8x1xf32>
    %210 = vector.broadcast %202 : vector<8x1xf32> to vector<8x512xf32>
    %211 = arith.subf %198, %210 : vector<8x512xf32>
    %cst_168 = arith.constant 9.99999974E-6 : f32
    %212 = vector.broadcast %cst_168 : f32 to vector<8x1xf32>
    %213 = arith.addf %209, %212 : vector<8x1xf32>
    %214 = math.rsqrt %213 : vector<8x1xf32>
    %215 = vector.broadcast %214 : vector<8x1xf32> to vector<8x512xf32>
    %216 = arith.mulf %211, %215 : vector<8x512xf32>
    %c0_169 = arith.constant 0 : index
    %c0_170 = arith.constant 0 : index
    %217 = vector.load %arg8[%c0_169, %c0_170] : memref<8x1xf32, #tpu.memory_space<vmem>>, vector<8x1xf32>
    %218 = vector.broadcast %217 : vector<8x1xf32> to vector<8x512xf32>
    %219 = arith.mulf %216, %218 : vector<8x512xf32>
    %c0_171 = arith.constant 0 : index
    %c0_172 = arith.constant 0 : index
    %220 = vector.load %arg9[%c0_171, %c0_172] : memref<8x1xf32, #tpu.memory_space<vmem>>, vector<8x1xf32>
    %221 = vector.broadcast %220 : vector<8x1xf32> to vector<8x512xf32>
    %222 = arith.addf %219, %221 : vector<8x512xf32>
    %c0_173 = arith.constant 0 : index
    %c128_174 = arith.constant 128 : index
    %223 = vector.load %arg0[%c0_173, %c128_174] : memref<8x768xf32, #tpu.memory_space<vmem>>, vector<8x512xf32>
    %c0_175 = arith.constant 0 : index
    %c0_176 = arith.constant 0 : index
    %224 = vector.load %arg10[%c0_175, %c0_176] : memref<8x8xf32, #tpu.memory_space<vmem>>, vector<8x8xf32>
    %cst_177 = arith.constant dense<0.000000e+00> : vector<8x512xf32>
    %225 = tpu.matmul %224, %223, %cst_177 {dimension_numbers = #tpu.dot_dimension_numbers<[1], [0], [0], [1], [0, 0, 1, 1], [], []>} : vector<8x8xf32>, vector<8x512xf32>, vector<8x512xf32> -> vector<8x512xf32>
    %c0_178 = arith.constant 0 : index
    %c0_179 = arith.constant 0 : index
    %226 = vector.load %arg11[%c0_178, %c0_179] : memref<8x1xf32, #tpu.memory_space<vmem>>, vector<8x1xf32>
    %227 = vector.broadcast %226 : vector<8x1xf32> to vector<8x512xf32>
    %228 = arith.addf %225, %227 : vector<8x512xf32>
    %229 = arith.addf %222, %228 : vector<8x512xf32>
    %cst_180 = arith.constant 0.000000e+00 : f32
    %230 = vector.broadcast %cst_180 : f32 to vector<8x512xf32>
    %231 = arith.maximumf %229, %230 : vector<8x512xf32>
    %c0_181 = arith.constant 0 : index
    %c0_182 = arith.constant 0 : index
    %232 = vector.load %arg12[%c0_181, %c0_182] : memref<8x512xf32, #tpu.memory_space<vmem>>, vector<8x512xf32>
    tpu.vector_store %arg12[%c0_181, %c0_182], %231 {strides = array<i32>} : memref<8x512xf32, #tpu.memory_space<vmem>>, vector<8x512xf32>,
    return
  }
}

</mosaic_0001>

<bundles_post_ra>
// kernel: residual_block_forward.1
= control target key start
LH: loop header
LB: loop body
LE: loop exit
PB: predicated region body
PF: predicated region fallthrough
CT: control target
= control target key end

     0   :  { %v48_v0 = vlaneseq  ;;  %s4271_s23 = smov 112   ;;  %s4272_s26 = smov 111   ;;  %vm114_vm0 = vcmask 916480   ;;  %v4279_v58 = vmov 0.0   ;;  %vm72_vm1 = vcmask 908288   ;;  %s5031_s1 = inlined_call_operand.vmem [shape: f32[9,1,512], index: 1, kind: input, shape index: {}]   ;;  %s5032_s0 = inlined_call_operand.vmem [shape: f32[8,768], index: 0, kind: input, shape index: {}]   ;;  %s5033_s3 = inlined_call_operand.vmem [shape: f32[8,1], index: 3, kind: input, shape index: {}]   ;;  %s5034_s5 = inlined_call_operand.vmem [shape: f32[8,1], index: 5, kind: input, shape index: {}]   ;;  %s5035_s2 = inlined_call_operand.vmem [shape: f32[9,8,8], index: 2, kind: input, shape index: {}]   ;;  %s5036_s4 = inlined_call_operand.vmem [shape: f32[8,1], index: 4, kind: input, shape index: {}]   ;;  %s5037_s7 = inlined_call_operand.vmem [shape: f32[8,1], index: 7, kind: input, shape index: {}]   ;;  %s5038_s6 = inlined_call_operand.vmem [shape: f32[9,8,8], index: 6, kind: input, shape index: {}]   ;;  %s5039_s10 = inlined_call_operand.vmem [shape: f32[8,8], index: 10, kind: input, shape index: {}]   ;;  %s5040_s9 = inlined_call_operand.vmem [shape: f32[8,1], index: 9, kind: input, shape index: {}]   ;;  %s5041_s11 = inlined_call_operand.vmem [shape: f32[8,1], index: 11, kind: input, shape index: {}]   ;;  %s5042_s8 = inlined_call_operand.vmem [shape: f32[8,1], index: 8, kind: input, shape index: {}]   ;;  %s5043_s12 = inlined_call_operand.vmem [shape: f32[8,512], index: 12, kind: output, shape index: {}]  }
   0x1   :  { %v4121_v2 = vld [vmem:[%s5031_s1 + $0x4] sm:$0xf]  ;;  %v46_v11 = vld [vmem:[%s5031_s1] sm:$0xf]  ;;  %v4127_v16 = vld [vmem:[%s5031_s1 + $0x8] sm:$0xf]  ;;  %222 = vmatprep.mubr.f32.mxu0 %v4279_v58  ;;  %293 = vmatprep.mubr.f32.mxu1 %v4279_v58 }
   0x2   :  { %v49_v1 = vshrl.u32 %v48_v0, 7  ;;  %s4273_s29 = smov 113   ;;  %v4131_v21 = vld [vmem:[%s5031_s1 + $0xc] sm:$0xf]  ;;  %s4274_s14 = smov 127   ;;  %v41_v46 = vld [vmem:[%s5032_s0] sm:$0xff] }
   0x3   :  { %v4139_v26 = vld [vmem:[%s5031_s1 + $0x14] sm:$0xf]  ;;  %s4275_s17 = smov 1   ;;  %v4143_v31 = vld [vmem:[%s5031_s1 + $0x18] sm:$0xf]  ;;  %s4276_s20 = smov 15  }
   0x4   :  { %v4349_v3 = vsub.s32 2, %v49_v1  ;;  %v4351_v4 = vsub.s32 0, %v49_v1  ;;  %v4353_v5 = vsub.s32 3, %v49_v1  ;;  %v4355_v6 = vsub.s32 1, %v49_v1  ;;  %v4147_v36 = vld [vmem:[%s5031_s1 + $0x1c] sm:$0xf] }
   0x5   :  { %s4277_s24 = smov 16   ;;  %v4151_v41 = vld [vmem:[%s5031_s1 + $0x20] sm:$0xf]  ;;  %s4278_s28 = smov 17   ;;  %v4456_v55 = vld [vmem:[%s5032_s0 + $0x8] sm:$0xff]  ;;  %v4469_v1 = vld [vmem:[%s5032_s0 + $0x10] sm:$0xff] }
   0x6   :  { %v101_v7 = vrot.slane %v4121_v2, %v4349_v3  ;;  %v93_v8 = vrot.slane %v4121_v2, %v4351_v4  ;;  %v105_v9 = vrot.slane %v4121_v2, %v4353_v5  ;;  %v97_v10 = vrot.slane %v4121_v2, %v4355_v6  ;;  %v4448_v50 = vld [vmem:[%s5032_s0 + $0x20] sm:$0xff] }
   0x7   :  { %v55_v12 = vrot.slane %v46_v11, %v4355_v6  ;;  %v51_v13 = vrot.slane %v46_v11, %v4351_v4  ;;  %v63_v14 = vrot.slane %v46_v11, %v4353_v5  ;;  %v59_v15 = vrot.slane %v46_v11, %v4349_v3 }
   0x8   :  { %110 = vrot.lane.b32.xlu1 %v101_v7, %s4271_s23  ;;  %106 = vrot.lane.b32.xlu0 %v93_v8, %s4271_s23  ;;  %v475_v17 = vrot.slane %v4127_v16, %v4351_v4  ;;  %v479_v18 = vrot.slane %v4127_v16, %v4355_v6  ;;  %v487_v19 = vrot.slane %v4127_v16, %v4353_v5  ;;  %vm496_vm2 = vcmask 924672  }
   0x9   :  { %v483_v20 = vrot.slane %v4127_v16, %v4349_v3  ;;  %v695_v22 = vrot.slane %v4131_v21, %v4355_v6  ;;  %v691_v23 = vrot.slane %v4131_v21, %v4351_v4  ;;  %v699_v24 = vrot.slane %v4131_v21, %v4349_v3 }
   0xa   :  { %v703_v25 = vrot.slane %v4131_v21, %v4353_v5  ;;  %v1090_v27 = vrot.slane %v4139_v26, %v4351_v4  ;;  %v1094_v28 = vrot.slane %v4139_v26, %v4355_v6  ;;  %v1098_v29 = vrot.slane %v4139_v26, %v4349_v3 }
   0xb   :  { %v1102_v30 = vrot.slane %v4139_v26, %v4353_v5  ;;  %v1304_v32 = vrot.slane %v4143_v31, %v4351_v4  ;;  %v1308_v33 = vrot.slane %v4143_v31, %v4355_v6  ;;  %v1312_v34 = vrot.slane %v4143_v31, %v4349_v3 }
   0xc   :  { %112 = vrot.lane.b32.xlu1 %v105_v9, %s4271_s23  ;;  %108 = vrot.lane.b32.xlu0 %v97_v10, %s4271_s23  ;;  %v1316_v35 = vrot.slane %v4143_v31, %v4353_v5  ;;  %v1522_v37 = vrot.slane %v4147_v36, %v4355_v6  ;;  %v1518_v38 = vrot.slane %v4147_v36, %v4351_v4  ;;  %vm712_vm3 = vcmask 1039360  }
   0xd   :  { %v1530_v39 = vrot.slane %v4147_v36, %v4353_v5  ;;  %v1526_v40 = vrot.slane %v4147_v36, %v4349_v3  ;;  %v1732_v42 = vrot.slane %v4151_v41, %v4351_v4  ;;  %v1736_v43 = vrot.slane %v4151_v41, %v4355_v6 }
   0xe   :  { %v1740_v44 = vrot.slane %v4151_v41, %v4349_v3  ;;  %v1744_v45 = vrot.slane %v4151_v41, %v4353_v5  ;;  %vm743_vm4 = vcmask 7168   ;;  %vm527_vm5 = vcmask 121856  }
   0xf   :  { %vm145_vm6 = vcmask 130048   ;;  %vm315_vm7 = vcmask 138240   ;;  %vm154_vm8 = vcmask 64512  }
  0x10   :  { %66 = vrot.lane.b32.xlu1 %v55_v12, %s4272_s26  ;;  %64 = vrot.lane.b32.xlu0 %v51_v13, %s4272_s26  ;;  %v4478_v12 = vld [vmem:[%s5032_s0 + $0x18] sm:$0xff] }
  0x14   :  { %70 = vrot.lane.b32.xlu1 %v63_v14, %s4272_s26  ;;  %68 = vrot.lane.b32.xlu0 %v59_v15, %s4272_s26 }
  0x18   :  { %488 = vrot.lane.b32.xlu0 %v475_v17, %s4273_s29  ;;  %490 = vrot.lane.b32.xlu1 %v479_v18, %s4273_s29 }
  0x1c   :  { %494 = vrot.lane.b32.xlu1 %v487_v19, %s4273_s29  ;;  %492 = vrot.lane.b32.xlu0 %v483_v20, %s4273_s29 }
  0x20   :  { %706 = vrot.lane.b32.xlu1 %v695_v22, %s4274_s14  ;;  %704 = vrot.lane.b32.xlu0 %v691_v23, %s4274_s14 }
  0x24   :  { %708 = vrot.lane.b32.xlu0 %v699_v24, %s4274_s14  ;;  %710 = vrot.lane.b32.xlu1 %v703_v25, %s4274_s14 }
  0x28   :  { %1103 = vrot.lane.b32.xlu0 %v1090_v27, %s4275_s17  ;;  %1105 = vrot.lane.b32.xlu1 %v1094_v28, %s4275_s17 }
  0x2c   :  { %1107 = vrot.lane.b32.xlu0 %v1098_v29, %s4275_s17  ;;  %1109 = vrot.lane.b32.xlu1 %v1102_v30, %s4275_s17 }
  0x30   :  { %1317 = vrot.lane.b32.xlu0 %v1304_v32, %s4276_s20  ;;  %1319 = vrot.lane.b32.xlu1 %v1308_v33, %s4276_s20 }
  0x34   :  { %1321 = vrot.lane.b32.xlu0 %v1312_v34, %s4276_s20  ;;  %1323 = vrot.lane.b32.xlu1 %v1316_v35, %s4276_s20 }
  0x38   :  { %1533 = vrot.lane.b32.xlu1 %v1522_v37, %s4277_s24  ;;  %1531 = vrot.lane.b32.xlu0 %v1518_v38, %s4277_s24 }
  0x3c   :  { %1537 = vrot.lane.b32.xlu1 %v1530_v39, %s4277_s24  ;;  %1535 = vrot.lane.b32.xlu0 %v1526_v40, %s4277_s24 }
  0x40   :  { %1745 = vrot.lane.b32.xlu1 %v1732_v42, %s4278_s28  ;;  %1747 = vrot.lane.b32.xlu0 %v1736_v43, %s4278_s28 }
  0x44   :  { %1749 = vrot.lane.b32.xlu1 %v1740_v44, %s4278_s28  ;;  %1751 = vrot.lane.b32.xlu0 %v1744_v45, %s4278_s28 }
  0x7a   :  { %v111_v47 = vpop.permute.xlu1 %110  ;;  %v107_v48 = vpop.permute.xlu0 %106 }
  0x7b   :  { %v123_v49 = vmul.f32 %v107_v48, %v41_v46 }
  0x7d   :  { %135 = vrot.lane.b32.xlu0 %v123_v49, %s4277_s24 }
  0x7e   :  { %v113_v51 = vpop.permute.xlu1 %112  ;;  %v109_v52 = vpop.permute.xlu0 %108 }
  0x7f   :  { %v127_v53 = vmul.f32 %v113_v51, %v4448_v50  ;;  %v115_v54 = vsel %vm114_vm0, %v107_v48, %v109_v52  ;;  %v116_v0 = vsel %vm114_vm0, %v109_v52, %v111_v47  ;;  %v117_v10 = vsel %vm114_vm0, %v111_v47, %v113_v51  ;;  %v4518_v47 = vld [vmem:[%s5032_s0 + $0x28] sm:$0xff] }
  0x80   :  { %v124_v60 = vmul.f32 %v115_v54, %v4456_v55  ;;  %v125_v9 = vmul.f32 %v116_v0, %v4469_v1  ;;  %v126_v16 = vmul.f32 %v117_v10, %v4478_v12 }
  0x81   :  { %143 = vrot.lane.b32.xlu0 %v127_v53, %s4277_s24 }
  0x82   :  { %v67_v56 = vpop.permute.xlu1 %66  ;;  %v65_v57 = vpop.permute.xlu0 %64 }
  0x83   :  { %v81_v59 = vmul.f32 %v65_v57, %v41_v46  ;;  %v73_v17 = vsel %vm72_vm1, %v65_v57, %v67_v56 }
  0x84   :  { %v82_v22 = vmul.f32 %v73_v17, %v4456_v55 }
  0x85   :  { %137 = vrot.lane.b32.xlu0 %v124_v60, %s4277_s24  ;;  %305 = vrot.lane.b32.xlu1 %v81_v59, %s4278_s28 }
  0x86   :  { %v71_v61 = vpop.permute.xlu1 %70  ;;  %v69_v62 = vpop.permute.xlu0 %68 }
  0x87   :  { %v85_v63 = vmul.f32 %v71_v61, %v4448_v50  ;;  %v74_v11 = vsel %vm72_vm1, %v67_v56, %v69_v62  ;;  %v75_v18 = vsel %vm72_vm1, %v69_v62, %v71_v61 }
  0x88   :  { %v83_v15 = vmul.f32 %v74_v11, %v4469_v1  ;;  %v84_v21 = vmul.f32 %v75_v18, %v4478_v12 }
  0x89   :  { %313 = vrot.lane.b32.xlu1 %v85_v63, %s4278_s28 }
  0x8a   :  { %v489_v2 = vpop.permute.xlu0 %488  ;;  %v491_v7 = vpop.permute.xlu1 %490 }
  0x8b   :  { %v505_v8 = vmul.f32 %v489_v2, %v41_v46  ;;  %v497_v23 = vsel %vm496_vm2, %v489_v2, %v491_v7 }
  0x8c   :  { %v506_v27 = vmul.f32 %v497_v23, %v4456_v55 }
  0x8d   :  { %517 = vrot.lane.b32.xlu0 %v505_v8, %s4276_s20  ;;  %139 = vrot.lane.b32.xlu1 %v125_v9, %s4277_s24 }
  0x8e   :  { %v495_v13 = vpop.permute.xlu1 %494  ;;  %v493_v14 = vpop.permute.xlu0 %492 }
  0x8f   :  { %v498_v28 = vsel %vm496_vm2, %v491_v7, %v493_v14  ;;  %v509_v30 = vmul.f32 %v495_v13, %v4448_v50  ;;  %v499_v33 = vsel %vm496_vm2, %v493_v14, %v495_v13 }
  0x90   :  { %v507_v31 = vmul.f32 %v498_v28, %v4469_v1  ;;  %v508_v37 = vmul.f32 %v499_v33, %v4478_v12 }
  0x91   :  { %309 = vrot.lane.b32.xlu0 %v83_v15, %s4278_s28  ;;  %141 = vrot.lane.b32.xlu1 %v126_v16, %s4277_s24 }
  0x92   :  { %v707_v19 = vpop.permute.xlu1 %706  ;;  %v705_v20 = vpop.permute.xlu0 %704 }
  0x93   :  { %v721_v24 = vmul.f32 %v705_v20, %v41_v46  ;;  %v713_v38 = vsel %vm712_vm3, %v705_v20, %v707_v19 }
  0x94   :  { %v722_v42 = vmul.f32 %v713_v38, %v4456_v55 }
  0x95   :  { %311 = vrot.lane.b32.xlu0 %v84_v21, %s4278_s28  ;;  %307 = vrot.lane.b32.xlu1 %v82_v22, %s4278_s28 }
  0x96   :  { %v709_v25 = vpop.permute.xlu0 %708  ;;  %v711_v26 = vpop.permute.xlu1 %710 }
  0x97   :  { %v714_v34 = vsel %vm712_vm3, %v707_v19, %v709_v25  ;;  %v715_v39 = vsel %vm712_vm3, %v709_v25, %v711_v26  ;;  %v725_v44 = vmul.f32 %v711_v26, %v4448_v50 }
  0x98   :  { %v723_v36 = vmul.f32 %v714_v34, %v4469_v1  ;;  %v724_v41 = vmul.f32 %v715_v39, %v4478_v12 }
  0x99   :  { %519 = vrot.lane.b32.xlu0 %v506_v27, %s4276_s20  ;;  %733 = vrot.lane.b32.xlu1 %v721_v24, %s4275_s17 }
  0x9a   :  { %v1106_v29 = vpop.permute.xlu1 %1105  ;;  %v1104_v32 = vpop.permute.xlu0 %1103 }
  0x9b   :  { %v1119_v45 = vmul.f32 %v1104_v32, %v4456_v55  ;;  %v1111_v52 = vsel %vm743_vm4, %v1104_v32, %v1106_v29 }
  0x9c   :  { %v1120_v57 = vmul.f32 %v1111_v52, %v4469_v1 }
  0x9d   :  { %525 = vrot.lane.b32.xlu0 %v509_v30, %s4276_s20  ;;  %521 = vrot.lane.b32.xlu1 %v507_v31, %s4276_s20  ;;  %v4280_v31 = vmov 0  }
  0x9e   :  { %v1110_v35 = vpop.permute.xlu1 %1109  ;;  %v1108_v40 = vpop.permute.xlu0 %1107  ;;  %4265 = vset.pattern.permute.xlu0 %v4280_v31  ;;  %4266 = vset.pattern.permute.xlu1 %v4280_v31 }
  0x9f   :  { %v1123_v51 = vmul.f32 %v1110_v35, %v4518_v47  ;;  %v1112_v59 = vsel %vm743_vm4, %v1106_v29, %v1108_v40  ;;  %v1113_v2 = vsel %vm743_vm4, %v1108_v40, %v1110_v35  ;;  %v1940_v35 = vld [vmem:[%s5033_s3] sm:$0xff] }
  0xa0   :  { %v1121_v63 = vmul.f32 %v1112_v59, %v4478_v12  ;;  %v1122_v10 = vmul.f32 %v1113_v2, %v4448_v50 }
  0xa1   :  { %737 = vrot.lane.b32.xlu0 %v723_v36, %s4275_s17  ;;  %523 = vrot.lane.b32.xlu1 %v508_v37, %s4276_s20  ;;  %v1987_v36 = vld [vmem:[%s5034_s5] sm:$0xff] }
  0xa2   :  { %v1320_v43 = vpop.permute.xlu1 %1319  ;;  %v1318_v46 = vpop.permute.xlu0 %1317 }
  0xa3   :  { %v1333_v48 = vmul.f32 %v1318_v46, %v4456_v55  ;;  %v1325_v13 = vsel %vm527_vm5, %v1318_v46, %v1320_v43 }
  0xa4   :  { %v1334_v17 = vmul.f32 %v1325_v13, %v4469_v1 }
  0xa5   :  { %739 = vrot.lane.b32.xlu0 %v724_v41, %s4275_s17  ;;  %735 = vrot.lane.b32.xlu1 %v722_v42, %s4275_s17 }
  0xa6   :  { %v1324_v49 = vpop.permute.xlu1 %1323  ;;  %v1322_v53 = vpop.permute.xlu0 %1321 }
  0xa7   :  { %v1337_v54 = vmul.f32 %v1324_v49, %v4518_v47  ;;  %v1326_v60 = vsel %vm527_vm5, %v1320_v43, %v1322_v53  ;;  %v1327_v7 = vsel %vm527_vm5, %v1322_v53, %v1324_v49 }
  0xa8   :  { %v1335_v62 = vmul.f32 %v1326_v60, %v4478_v12  ;;  %v1336_v9 = vmul.f32 %v1327_v7, %v4448_v50  ;;  %v86_v60 = vld [vmem:[%s5035_s2] sm:$0xff]  ;;  %v4128_v7 = vld [vmem:[%s5035_s2 + $0x10] sm:$0xff] }
  0xa9   :  { %1131 = vrot.lane.b32.xlu0 %v1119_v45, %s4274_s14  ;;  %741 = vrot.lane.b32.xlu1 %v725_v44, %s4275_s17  ;;  %v4122_v45 = vld [vmem:[%s5035_s2 + $0x8] sm:$0xff] }
  0xaa   :  { %v1534_v56 = vpop.permute.xlu1 %1533  ;;  %v1532_v61 = vpop.permute.xlu0 %1531 }
  0xab   :  { %v1539_v8 = vsel %vm145_vm6, %v1532_v61, %v1534_v56  ;;  %v1547_v20 = vmul.f32 %v1532_v61, %v4456_v55 }
  0xac   :  { %v1548_v14 = vmul.f32 %v1539_v8, %v4469_v1  ;;  %v4135_v8 = vld [vmem:[%s5031_s1 + $0x10] sm:$0xf] }
  0xad   :  { %1139 = vrot.lane.b32.xlu0 %v1123_v51, %s4274_s14  ;;  %1345 = vrot.lane.b32.xlu1 %v1333_v48, %s4273_s29  ;;  %v911_v13 = vrot.slane %v4135_v8, %v4355_v6 }
  0xae   :  { %v1538_v0 = vpop.permute.xlu1 %1537  ;;  %v1536_v11 = vpop.permute.xlu0 %1535 }
  0xaf   :  { %v1540_v16 = vsel %vm145_vm6, %v1534_v56, %v1536_v11  ;;  %v1541_v22 = vsel %vm145_vm6, %v1536_v11, %v1538_v0  ;;  %v1551_v23 = vmul.f32 %v1538_v0, %v4518_v47 }
  0xb0   :  { %v1549_v18 = vmul.f32 %v1540_v16, %v4478_v12  ;;  %v1550_v26 = vmul.f32 %v1541_v22, %v4448_v50  ;;  %v907_v16 = vrot.slane %v4135_v8, %v4351_v4 }
  0xb1   :  { %1133 = vrot.lane.b32.xlu0 %v1120_v57, %s4274_s14  ;;  %1353 = vrot.lane.b32.xlu1 %v1337_v54, %s4273_s29 }
  0xb2   :  { %v1746_v15 = vpop.permute.xlu1 %1745  ;;  %v1748_v19 = vpop.permute.xlu0 %1747 }
  0xb3   :  { %v1753_v24 = vsel %vm315_vm7, %v1746_v15, %v1748_v19  ;;  %v1761_v33 = vmul.f32 %v1746_v15, %v4456_v55 }
  0xb4   :  { %v1762_v29 = vmul.f32 %v1753_v24, %v4469_v1  ;;  %v924_v24 = vmul.f32 %v907_v16, %v4456_v55 }
  0xb5   :  { %1349 = vrot.lane.b32.xlu0 %v1335_v62, %s4273_s29  ;;  %1135 = vrot.lane.b32.xlu1 %v1121_v63, %s4274_s14 }
  0xb6   :  { %v1750_v21 = vpop.permute.xlu1 %1749  ;;  %v1752_v27 = vpop.permute.xlu0 %1751 }
  0xb7   :  { %v1754_v25 = vsel %vm315_vm7, %v1748_v19, %v1750_v21  ;;  %v1755_v30 = vsel %vm315_vm7, %v1750_v21, %v1752_v27  ;;  %v1765_v34 = vmul.f32 %v1752_v27, %v4518_v47  ;;  %v925_v19 = vmul.f32 %v911_v13, %v4469_v1 }
  0xb8   :  { %v1763_v28 = vmul.f32 %v1754_v25, %v4478_v12  ;;  %v1764_v32 = vmul.f32 %v1755_v30, %v4448_v50  ;;  %v915_v25 = vrot.slane %v4135_v8, %v4349_v3 }
  0xb9   :  { %1351 = vrot.lane.b32.xlu0 %v1336_v9, %s4273_s29  ;;  %1137 = vrot.lane.b32.xlu1 %v1122_v10, %s4274_s14 }
  0xbd   :  { %1561 = vrot.lane.b32.xlu0 %v1548_v14, %s4271_s23  ;;  %1347 = vrot.lane.b32.xlu1 %v1334_v17, %s4273_s29 }
  0xc1   :  { %1559 = vrot.lane.b32.xlu0 %v1547_v20, %s4271_s23  ;;  %1563 = vrot.lane.b32.xlu1 %v1549_v18, %s4271_s23  ;;  %v919_v20 = vrot.slane %v4135_v8, %v4353_v5 }
  0xc3   :  { %v927_v27 = vmul.f32 %v919_v20, %v4448_v50  ;;  %v4136_v50 = vld [vmem:[%s5035_s2 + $0x20] sm:$0xff] }
  0xc5   :  { %1567 = vrot.lane.b32.xlu0 %v1551_v23, %s4271_s23  ;;  %1565 = vrot.lane.b32.xlu1 %v1550_v26, %s4271_s23  ;;  %v4132_v23 = vld [vmem:[%s5035_s2 + $0x18] sm:$0xff] }
  0xc9   :  { %1777 = vrot.lane.b32.xlu0 %v1763_v28, %s4272_s26  ;;  %1775 = vrot.lane.b32.xlu1 %v1762_v29, %s4272_s26  ;;  %v926_v29 = vmul.f32 %v915_v25, %v4478_v12  ;;  %v1977_v25 = vld [vmem:[%s5036_s4] sm:$0xff] }
  0xcd   :  { %1779 = vrot.lane.b32.xlu0 %v1764_v32, %s4272_s26  ;;  %1773 = vrot.lane.b32.xlu1 %v1761_v33, %s4272_s26 }
  0xd1   :  { %1781 = vrot.lane.b32.xlu1 %v1765_v34, %s4272_s26  ;;  %1943 = vperm.xlu0 %4265, %v1940_v35  }
  0xd5   :  { %1990 = vperm.xlu0 %4265, %v1987_v36   ;;  %v4140_v36 = vld [vmem:[%s5035_s2 + $0x28] sm:$0xff] }
  0xef   :  { %v136_v37 = vpop.permute.xlu0 %135 }
  0xf3   :  { %v144_v38 = vpop.permute.xlu0 %143 }
  0xf7   :  { %v306_v39 = vpop.permute.xlu1 %305  ;;  %v138_v40 = vpop.permute.xlu0 %137 }
  0xf8   :  { %v146_v46 = vsel %vm145_vm6, %v136_v37, %v138_v40 }
  0xfb   :  { %v314_v41 = vpop.permute.xlu1 %313 }
  0xff   :  { %v518_v42 = vpop.permute.xlu0 %517  ;;  %v140_v43 = vpop.permute.xlu1 %139 }
 0x100   :  { %v147_v44 = vsel %vm145_vm6, %v138_v40, %v140_v43 }
 0x101   :  { %158 = vmatprep.subr.mxu0 %v147_v44 }
 0x102   :  { %159 = vmatpush1.msra.mxu0 %v146_v46 }
 0x103   :  { %v310_v47 = vpop.permute.xlu0 %309  ;;  %4123 = vmatmul.mubr.msk.f32.vlgmr.msra.gmra.mrb[0].mxu0 %vm154_vm8, %v4122_v45  ;;  %v142_v48 = vpop.permute.xlu1 %141 }
 0x104   :  { %v149_v49 = vsel %vm145_vm6, %v142_v48, %v144_v38  ;;  %v148_v51 = vsel %vm145_vm6, %v140_v43, %v142_v48  ;;  %391 = vmatprep.mubr.f32.mxu0 %v4279_v58  ;;  %v4144_v48 = vld [vmem:[%s5035_s2 + $0x30] sm:$0xff] }
 0x105   :  { %229 = vmatprep.subr.mxu1 %v149_v49 }
 0x106   :  { %230 = vmatpush1.msra.mxu1 %v148_v51 }
 0x107   :  { %v312_v52 = vpop.permute.xlu0 %311  ;;  %4124 = vmatmul.mubr.msk.f32.vlgmr.msra.gmra.mrb[0].mxu1 %vm154_vm8, %v4122_v45  ;;  %v308_v53 = vpop.permute.xlu1 %307 }
 0x108   :  { %v317_v54 = vsel %vm315_vm7, %v308_v53, %v310_v47  ;;  %v319_v56 = vsel %vm315_vm7, %v312_v52, %v314_v41  ;;  %v316_v57 = vsel %vm315_vm7, %v306_v39, %v308_v53  ;;  %v318_v59 = vsel %vm315_vm7, %v310_v47, %v312_v52  ;;  %462 = vmatprep.mubr.f32.mxu1 %v4279_v58 }
 0x109   :  { %327 = vmatprep.subr.mxu0 %v317_v54  ;;  %398 = vmatprep.subr.mxu1 %v319_v56 }
 0x10a   :  { %328 = vmatpush1.msra.mxu0 %v316_v57  ;;  %399 = vmatpush1.msra.mxu1 %v318_v59 }
 0x10b   :  { %v520_v61 = vpop.permute.xlu0 %519  ;;  %4125 = vmatmul.mubr.msk.f32.vlgmr.msra.gmra.mrb[0].mxu0 %vm154_vm8, %v86_v60  ;;  %v734_v62 = vpop.permute.xlu1 %733 }
 0x10c   :  { %603 = vmatprep.mubr.f32.mxu0 %v4279_v58  ;;  %v528_v9 = vsel %vm527_vm5, %v518_v42, %v520_v61 }
 0x10f   :  { %v526_v63 = vpop.permute.xlu0 %525  ;;  %4126 = vmatmul.mubr.msk.f32.vlgmr.msra.gmra.mrb[0].mxu1 %vm154_vm8, %v86_v60  ;;  %v522_v0 = vpop.permute.xlu1 %521  ;;  %v4148_v60 = vld [vmem:[%s5035_s2 + $0x38] sm:$0xff] }
 0x110   :  { %v529_v2 = vsel %vm527_vm5, %v520_v61, %v522_v0  ;;  %674 = vmatprep.mubr.f32.mxu1 %v4279_v58 }
 0x111   :  { %539 = vmatprep.subr.mxu0 %v529_v2 }
 0x112   :  { %540 = vmatpush1.msra.mxu0 %v528_v9 }
 0x113   :  { %v738_v10 = vpop.permute.xlu0 %737  ;;  %4129 = vmatmul.mubr.msk.f32.vlgmr.msra.gmra.mrb[0].mxu0 %vm154_vm8, %v4128_v7  ;;  %v524_v11 = vpop.permute.xlu1 %523 }
 0x114   :  { %v531_v14 = vsel %vm527_vm5, %v524_v11, %v526_v63  ;;  %v530_v15 = vsel %vm527_vm5, %v522_v0, %v524_v11  ;;  %819 = vmatprep.mubr.f32.mxu0 %v4279_v58 }
 0x115   :  { %610 = vmatprep.subr.mxu1 %v531_v14 }
 0x116   :  { %611 = vmatpush1.msra.mxu1 %v530_v15 }
 0x117   :  { %v740_v17 = vpop.permute.xlu0 %739  ;;  %4130 = vmatmul.mubr.msk.f32.vlgmr.msra.gmra.mrb[0].mxu1 %vm154_vm8, %v4128_v7  ;;  %v736_v18 = vpop.permute.xlu1 %735  ;;  %v4152_v7 = vld [vmem:[%s5035_s2 + $0x40] sm:$0xff] }
 0x118   :  { %v745_v21 = vsel %vm743_vm4, %v736_v18, %v738_v10  ;;  %v744_v22 = vsel %vm743_vm4, %v734_v62, %v736_v18  ;;  %890 = vmatprep.mubr.f32.mxu1 %v4279_v58  ;;  %v746_v55 = vsel %vm743_vm4, %v738_v10, %v740_v17 }
 0x119   :  { %755 = vmatprep.subr.mxu0 %v745_v21 }
 0x11a   :  { %756 = vmatpush1.msra.mxu0 %v744_v22 }
 0x11b   :  { %v1132_v26 = vpop.permute.xlu0 %1131  ;;  %4133 = vmatmul.mubr.msk.f32.vlgmr.msra.gmra.mrb[0].mxu0 %vm154_vm8, %v4132_v23  ;;  %v742_v1 = vpop.permute.xlu1 %741  ;;  %933 = vmatprep.subr.mxu0 %v925_v19 }
 0x11c   :  { %v747_v28 = vsel %vm743_vm4, %v740_v17, %v742_v1  ;;  %934 = vmatpush1.msra.mxu0 %v924_v24  ;;  %997 = vmatprep.mubr.f32.mxu0 %v4279_v58 }
 0x11d   :  { %826 = vmatprep.subr.mxu1 %v747_v28 }
 0x11e   :  { %827 = vmatpush1.msra.mxu1 %v746_v55 }
 0x11f   :  { %v1140_v30 = vpop.permute.xlu0 %1139  ;;  %4134 = vmatmul.mubr.msk.f32.vlgmr.msra.gmra.mrb[0].mxu1 %vm154_vm8, %v4132_v23  ;;  %v1346_v31 = vpop.permute.xlu1 %1345  ;;  %1004 = vmatprep.subr.mxu1 %v927_v27 }
 0x120   :  { %1005 = vmatpush1.msra.mxu1 %v926_v29  ;;  %1068 = vmatprep.mubr.f32.mxu1 %v4279_v58  ;;  %v2016_v29 = vld [vmem:[%s5031_s1] sm:$0xf] }
 0x121   :  { %v2025_v55 = vrot.slane %v2016_v29, %v4355_v6 }
 0x123   :  { %v1134_v32 = vpop.permute.xlu0 %1133  ;;  %4137 = vmatmul.mubr.msk.f32.vlgmr.msra.gmra.mrb[0].mxu0 %vm154_vm8, %v4136_v50  ;;  %v1354_v12 = vpop.permute.xlu1 %1353 }
 0x124   :  { %1216 = vmatprep.mubr.f32.mxu0 %v4279_v58  ;;  %v1141_v37 = vsel %vm712_vm3, %v1132_v26, %v1134_v32  ;;  %v4155_v26 = vld [vmem:[%s5031_s1 + $0x4] sm:$0xf] }
 0x125   :  { %v2061_v1 = vrot.slane %v4155_v26, %v4351_v4  ;;  %v2065_v27 = vrot.slane %v4155_v26, %v4355_v6  ;;  %v2073_v28 = vrot.slane %v4155_v26, %v4353_v5 }
 0x127   :  { %v1350_v33 = vpop.permute.xlu0 %1349  ;;  %4138 = vmatmul.mubr.msk.f32.vlgmr.msra.gmra.mrb[0].mxu1 %vm154_vm8, %v4136_v50  ;;  %v1136_v34 = vpop.permute.xlu1 %1135 }
 0x128   :  { %v1142_v35 = vsel %vm712_vm3, %v1134_v32, %v1136_v34  ;;  %1287 = vmatprep.mubr.f32.mxu1 %v4279_v58 }
 0x129   :  { %1152 = vmatprep.subr.mxu0 %v1142_v35  ;;  %v4173_v35 = vld [vmem:[%s5031_s1 + $0x14] sm:$0xf] }
 0x12a   :  { %1153 = vmatpush1.msra.mxu0 %v1141_v37  ;;  %v3058_v37 = vrot.slane %v4173_v35, %v4353_v5 }
 0x12b   :  { %v1352_v38 = vpop.permute.xlu0 %1351  ;;  %4141 = vmatmul.mubr.msk.f32.vlgmr.msra.gmra.mrb[0].mxu0 %vm154_vm8, %v4140_v36  ;;  %v1138_v39 = vpop.permute.xlu1 %1137 }
 0x12c   :  { %v1143_v40 = vsel %vm712_vm3, %v1136_v34, %v1138_v39  ;;  %v1144_v41 = vsel %vm712_vm3, %v1138_v39, %v1140_v30  ;;  %1430 = vmatprep.mubr.f32.mxu0 %v4279_v58  ;;  %v1358_v42 = vsel %vm496_vm2, %v1352_v38, %v1354_v12  ;;  %v1357_v43 = vsel %vm496_vm2, %v1350_v33, %v1352_v38  ;;  %v4165_v12 = vld [vmem:[%s5031_s1 + $0xc] sm:$0xf]  ;;  %v4177_v38 = vld [vmem:[%s5031_s1 + $0x18] sm:$0xf] }
 0x12d   :  { %1223 = vmatprep.subr.mxu1 %v1144_v41  ;;  %v2033_v30 = vrot.slane %v2016_v29, %v4353_v5  ;;  %v2663_v34 = vrot.slane %v4165_v12, %v4353_v5  ;;  %v3263_v39 = vrot.slane %v4177_v38, %v4355_v6  ;;  %v4181_v41 = vld [vmem:[%s5031_s1 + $0x1c] sm:$0xf] }
 0x12e   :  { %1224 = vmatpush1.msra.mxu1 %v1143_v40  ;;  %v3271_v40 = vrot.slane %v4177_v38, %v4353_v5 }
 0x12f   :  { %v1562_v44 = vpop.permute.xlu0 %1561  ;;  %4142 = vmatmul.mubr.msk.f32.vlgmr.msra.gmra.mrb[0].mxu1 %vm154_vm8, %v4140_v36  ;;  %1437 = vmatprep.subr.mxu1 %v1358_v42  ;;  %v1348_v45 = vpop.permute.xlu1 %1347  ;;  %v3050_v36 = vrot.slane %v4173_v35, %v4355_v6  ;;  %v3476_v42 = vrot.slane %v4181_v41, %v4355_v6 }
 0x130   :  { %v1355_v46 = vsel %vm496_vm2, %v1346_v31, %v1348_v45  ;;  %1438 = vmatpush1.msra.mxu1 %v1357_v43  ;;  %v1356_v47 = vsel %vm496_vm2, %v1348_v45, %v1350_v33  ;;  %1501 = vmatprep.mubr.f32.mxu1 %v4279_v58  ;;  %v4161_v31 = vld [vmem:[%s5031_s1 + $0x8] sm:$0xf]  ;;  %v2655_v33 = vrot.slane %v4165_v12, %v4355_v6 }
 0x131   :  { %1366 = vmatprep.subr.mxu0 %v1356_v47  ;;  %v2442_v50 = vrot.slane %v4161_v31, %v4355_v6  ;;  %v2450_v32 = vrot.slane %v4161_v31, %v4353_v5  ;;  %v3484_v43 = vrot.slane %v4181_v41, %v4353_v5 }
 0x132   :  { %1367 = vmatpush1.msra.mxu0 %v1355_v46 }
 0x133   :  { %v1560_v49 = vpop.permute.xlu0 %1559  ;;  %4145 = vmatmul.mubr.msk.f32.vlgmr.msra.gmra.mrb[0].mxu0 %vm154_vm8, %v4144_v48  ;;  %v1564_v51 = vpop.permute.xlu1 %1563 }
 0x134   :  { %v1569_v52 = vsel %vm114_vm0, %v1560_v49, %v1562_v44  ;;  %v1570_v53 = vsel %vm114_vm0, %v1562_v44, %v1564_v51  ;;  %1644 = vmatprep.mubr.f32.mxu0 %v4279_v58  ;;  %v4185_v44 = vld [vmem:[%s5031_s1 + $0x20] sm:$0xf] }
 0x135   :  { %1580 = vmatprep.subr.mxu0 %v1570_v53  ;;  %v3685_v45 = vrot.slane %v4185_v44, %v4351_v4  ;;  %v3693_v46 = vrot.slane %v4185_v44, %v4349_v3 }
 0x136   :  { %1581 = vmatpush1.msra.mxu0 %v1569_v52 }
 0x137   :  { %v1568_v54 = vpop.permute.xlu0 %1567  ;;  %4146 = vmatmul.mubr.msk.f32.vlgmr.msra.gmra.mrb[0].mxu1 %vm154_vm8, %v4144_v48  ;;  %v1566_v56 = vpop.permute.xlu1 %1565 }
 0x138   :  { %v1571_v57 = vsel %vm114_vm0, %v1564_v51, %v1566_v56  ;;  %v1572_v59 = vsel %vm114_vm0, %v1566_v56, %v1568_v54  ;;  %1715 = vmatprep.mubr.f32.mxu1 %v4279_v58 }
 0x139   :  { %1651 = vmatprep.subr.mxu1 %v1572_v59 }
 0x13a   :  { %1652 = vmatpush1.msra.mxu1 %v1571_v57 }
 0x13b   :  { %v1778_v61 = vpop.permute.xlu0 %1777  ;;  %4149 = vmatmul.mubr.msk.f32.vlgmr.msra.gmra.mrb[0].mxu0 %vm154_vm8, %v4148_v60  ;;  %v1776_v62 = vpop.permute.xlu1 %1775 }
 0x13c   :  { %v1784_v63 = vsel %vm72_vm1, %v1776_v62, %v1778_v61  ;;  %1858 = vmatprep.mubr.f32.mxu0 %v4279_v58 }
 0x13d   :  { %1794 = vmatprep.subr.mxu0 %v1784_v63  ;;  %v2069_v63 = vrot.slane %v4155_v26, %v4349_v3 }
 0x13f   :  { %4150 = vmatmul.mubr.msk.f32.vlgmr.msra.gmra.mrb[0].mxu1 %vm154_vm8, %v4148_v60  ;;  %v1774_v0 = vpop.permute.xlu1 %1773  ;;  %v1780_v8 = vpop.permute.xlu0 %1779 }
 0x140   :  { %v1783_v2 = vsel %vm72_vm1, %v1774_v0, %v1776_v62  ;;  %1929 = vmatprep.mubr.f32.mxu1 %v4279_v58  ;;  %v1785_v11 = vsel %vm72_vm1, %v1778_v61, %v1780_v8  ;;  %v2021_v0 = vrot.slane %v2016_v29, %v4351_v4 }
 0x141   :  { %1795 = vmatpush1.msra.mxu0 %v1783_v2  ;;  %v2029_v2 = vrot.slane %v2016_v29, %v4349_v3 }
 0x143   :  { %4153 = vmatmul.mubr.msk.f32.vlgmr.msra.gmra.mrb[0].mxu0 %vm154_vm8, %v4152_v7  ;;  %v1782_v9 = vpop.permute.xlu1 %1781 }
 0x144   :  { %v1786_v10 = vsel %vm72_vm1, %v1780_v8, %v1782_v9  ;;  %2187 = vmatprep.mubr.f32.mxu0 %v4279_v58  ;;  %v2446_v8 = vrot.slane %v4161_v31, %v4349_v3  ;;  %v2651_v9 = vrot.slane %v4165_v12, %v4351_v4 }
 0x145   :  { %1865 = vmatprep.subr.mxu1 %v1786_v10  ;;  %v2659_v10 = vrot.slane %v4165_v12, %v4349_v3 }
 0x146   :  { %1866 = vmatpush1.msra.mxu1 %v1785_v11  ;;  %v3046_v11 = vrot.slane %v4173_v35, %v4351_v4 }
 0x147   :  { %4154 = vmatmul.mubr.msk.f32.vlgmr.msra.gmra.mrb[0].mxu1 %vm154_vm8, %v4152_v7  ;;  %v2438_v7 = vrot.slane %v4161_v31, %v4351_v4 }
 0x148   :  { %2258 = vmatprep.mubr.f32.mxu1 %v4279_v58 }
 0x150   :  { %v1944_v13 = vpop.permute.xlu0 %1943 }
 0x216   :  { %v1860_v14 = vpop.f32.mrb[0].mxu0 }
 0x217   :  { %v1946_v15 = vadd.f32 %v1944_v13, %v1860_v14  ;;  %v1862_v16 = vpop.f32.mrb[1].mxu0  ;;  %v3259_v14 = vrot.slane %v4177_v38, %v4351_v4 }
 0x218   :  { %v1947_v17 = vadd.f32 %v1944_v13, %v1862_v16 }
 0x21a   :  { %v1950_v18 = vadd.f32 %v1947_v17, %v1946_v15  ;;  %v1931_v19 = vpop.f32.mrb[0].mxu1 }
 0x21b   :  { %v1948_v20 = vadd.f32 %v1944_v13, %v1931_v19  ;;  %v1933_v21 = vpop.f32.mrb[1].mxu1 }
 0x21c   :  { %v1949_v22 = vadd.f32 %v1944_v13, %v1933_v21  ;;  %v3054_v13 = vrot.slane %v4173_v35, %v4349_v3  ;;  %v3689_v21 = vrot.slane %v4185_v44, %v4355_v6 }
 0x21d   :  { %v1951_v23 = vadd.f32 %v1950_v18, %v1948_v20  ;;  %v3480_v18 = vrot.slane %v4181_v41, %v4349_v3 }
 0x21f   :  { %v1952_v24 = vadd.f32 %v1951_v23, %v1949_v22 }
 0x221   :  { %1953 = vadd.xlane.f32.xlu1 %v1952_v24  ;;  %v1991_v24 = vpop.permute.xlu0 %1990 }
 0x232   :  { %1980 = vperm.xlu1 %4266, %v1977_v25  }
 0x236   :  { %2074 = vrot.lane.b32.xlu1 %v2061_v1, %s4271_s23 }
 0x23a   :  { %2076 = vrot.lane.b32.xlu1 %v2065_v27, %s4271_s23 }
 0x23e   :  { %2080 = vrot.lane.b32.xlu1 %v2073_v28, %s4271_s23 }
 0x242   :  { %2036 = vrot.lane.b32.xlu1 %v2025_v55, %s4272_s26 }
 0x246   :  { %2040 = vrot.lane.b32.xlu1 %v2033_v30, %s4272_s26 }
 0x24a   :  { %2453 = vrot.lane.b32.xlu1 %v2442_v50, %s4273_s29 }
 0x24e   :  { %2457 = vrot.lane.b32.xlu1 %v2450_v32, %s4273_s29 }
 0x252   :  { %2666 = vrot.lane.b32.xlu1 %v2655_v33, %s4274_s14 }
 0x256   :  { %2670 = vrot.lane.b32.xlu1 %v2663_v34, %s4274_s14 }
 0x25a   :  { %3061 = vrot.lane.b32.xlu1 %v3050_v36, %s4275_s17 }
 0x25e   :  { %3065 = vrot.lane.b32.xlu1 %v3058_v37, %s4275_s17 }
 0x262   :  { %3274 = vrot.lane.b32.xlu1 %v3263_v39, %s4276_s20 }
 0x266   :  { %3278 = vrot.lane.b32.xlu1 %v3271_v40, %s4276_s20 }
 0x26a   :  { %3487 = vrot.lane.b32.xlu1 %v3476_v42, %s4277_s24 }
 0x26e   :  { %3491 = vrot.lane.b32.xlu1 %v3484_v43, %s4277_s24 }
 0x272   :  { %3698 = vrot.lane.b32.xlu1 %v3685_v45, %s4278_s28 }
 0x276   :  { %3702 = vrot.lane.b32.xlu1 %v3693_v46, %s4278_s28 }
 0x2ae   :  { %v1954_v47 = vpop.xlane.xlu1 %1953 }
 0x2af   :  { %v1956_v48 = vmul.f32 0.001953125, %v1954_v47 }
 0x2b1   :  { %v1957_v49 = vsub.f32 %v1946_v15, %v1956_v48  ;;  %v1958_v51 = vsub.f32 %v1947_v17, %v1956_v48  ;;  %v4745_v52 = vsub.f32 %v1948_v20, %v1956_v48  ;;  %v1960_v53 = vsub.f32 %v1949_v22, %v1956_v48 }
 0x2b2   :  { %v3267_v15 = vrot.slane %v4177_v38, %v4349_v3  ;;  %v1981_v16 = vpop.permute.xlu1 %1980  ;;  %v3472_v17 = vrot.slane %v4181_v41, %v4351_v4  ;;  %v3697_v22 = vrot.slane %v4185_v44, %v4353_v5 }
 0x2b3   :  { %v1961_v54 = vmul.f32 %v1957_v49, %v1957_v49  ;;  %v1962_v56 = vmul.f32 %v1958_v51, %v1958_v51  ;;  %v1963_v57 = vmul.f32 %v4745_v52, %v4745_v52  ;;  %v1964_v60 = vmul.f32 %v1960_v53, %v1960_v53 }
 0x2b5   :  { %v1965_v59 = vadd.f32 %v1962_v56, %v1961_v54 }
 0x2b6   :  { %v2075_v19 = vpop.permute.xlu1 %2074 }
 0x2b7   :  { %v1966_v61 = vadd.f32 %v1965_v59, %v1963_v57  ;;  %v2090_v20 = vmul.f32 0.0, %v2075_v19 }
 0x2b9   :  { %v1967_v62 = vadd.f32 %v1966_v61, %v1964_v60 }
 0x2ba   :  { %v2077_v23 = vpop.permute.xlu1 %2076 }
 0x2bb   :  { %1968 = vadd.xlane.f32.xlu0 %v1967_v62 }
 0x2be   :  { %v2081_v25 = vpop.permute.xlu1 %2080 }
 0x2c2   :  { %v2037_v29 = vpop.permute.xlu1 %2036 }
 0x2c6   :  { %v2041_v31 = vpop.permute.xlu1 %2040 }
 0x2ca   :  { %v2454_v36 = vpop.permute.xlu1 %2453 }
 0x2ce   :  { %v2458_v48 = vpop.permute.xlu1 %2457 }
 0x2d1   :  { %2078 = vrot.lane.b32.xlu0 %v2069_v63, %s4271_s23 }
 0x2d2   :  { %v2667_v59 = vpop.permute.xlu1 %2666 }
 0x2d5   :  { %2034 = vrot.lane.b32.xlu0 %v2021_v0, %s4272_s26 }
 0x2d9   :  { %2038 = vrot.lane.b32.xlu0 %v2029_v2, %s4272_s26 }
 0x2dd   :  { %2451 = vrot.lane.b32.xlu0 %v2438_v7, %s4273_s29 }
 0x2e1   :  { %2455 = vrot.lane.b32.xlu0 %v2446_v8, %s4273_s29 }
 0x2e5   :  { %2664 = vrot.lane.b32.xlu0 %v2651_v9, %s4274_s14 }
 0x2e9   :  { %2668 = vrot.lane.b32.xlu0 %v2659_v10, %s4274_s14  ;;  %v2671_v10 = vpop.permute.xlu1 %2670 }
 0x2ed   :  { %3059 = vrot.lane.b32.xlu0 %v3046_v11, %s4275_s17 }
 0x2f1   :  { %3063 = vrot.lane.b32.xlu0 %v3054_v13, %s4275_s17 }
 0x2f5   :  { %3272 = vrot.lane.b32.xlu0 %v3259_v14, %s4276_s20 }
 0x2f9   :  { %3276 = vrot.lane.b32.xlu0 %v3267_v15, %s4276_s20 }
 0x2fd   :  { %3485 = vrot.lane.b32.xlu0 %v3472_v17, %s4277_s24  ;;  %v3062_v17 = vpop.permute.xlu1 %3061 }
 0x301   :  { %3489 = vrot.lane.b32.xlu0 %v3480_v18, %s4277_s24 }
 0x305   :  { %2102 = vrot.lane.b32.xlu0 %v2090_v20, %s4277_s24 }
 0x309   :  { %3700 = vrot.lane.b32.xlu0 %v3689_v21, %s4278_s28 }
 0x30d   :  { %3704 = vrot.lane.b32.xlu0 %v3697_v22, %s4278_s28 }
 0x348   :  { %v1969_v26 = vpop.xlane.xlu0 %1968 }
 0x349   :  { %v1970_v1 = vmul.f32 0.001953125, %v1969_v26 }
 0x34b   :  { %v1971_v27 = vadd.f32 1e-05, %v1970_v1 }
 0x34c   :  { %v2079_v28 = vpop.permute.xlu0 %2078 }
 0x34d   :  { %4267 = vrsqrt.f32 %v1971_v27  ;;  %v2083_v60 = vsel %vm114_vm0, %v2077_v23, %v2079_v28  ;;  %v2084_v0 = vsel %vm114_vm0, %v2079_v28, %v2081_v25 }
 0x350   :  { %v2035_v55 = vpop.permute.xlu0 %2034 }
 0x351   :  { %v2050_v30 = vmul.f32 0.0, %v2035_v55  ;;  %v2042_v11 = vsel %vm72_vm1, %v2035_v55, %v2037_v29 }
 0x353   :  { %2270 = vrot.lane.b32.xlu1 %v2050_v30, %s4278_s28 }
 0x354   :  { %v2039_v50 = vpop.permute.xlu0 %2038 }
 0x355   :  { %v2043_v2 = vsel %vm72_vm1, %v2037_v29, %v2039_v50  ;;  %v2044_v13 = vsel %vm72_vm1, %v2039_v50, %v2041_v31 }
 0x357   :  { %v4268_v32 = vpop.eup %4267 }
 0x358   :  { %v1973_v12 = vmul.f32 %v4268_v32, %v1957_v49  ;;  %v1974_v33 = vmul.f32 %v4268_v32, %v1958_v51  ;;  %v1976_v34 = vmul.f32 %v4268_v32, %v1960_v53  ;;  %v2452_v35 = vpop.permute.xlu0 %2451  ;;  %v1975_v37 = vmul.f32 %v4268_v32, %v4745_v52 }
 0x359   :  { %v2467_v38 = vmul.f32 0.0, %v2452_v35  ;;  %v2082_v51 = vsel %vm114_vm0, %v2075_v19, %v2077_v23  ;;  %v2459_v18 = vsel %vm496_vm2, %v2452_v35, %v2454_v36 }
 0x35a   :  { %v1986_v39 = vmul.f32 %v1981_v16, %v1976_v34  ;;  %v1984_v40 = vmul.f32 %v1981_v16, %v1974_v33  ;;  %v1983_v41 = vmul.f32 %v1981_v16, %v1973_v12  ;;  %v1985_v44 = vmul.f32 %v1981_v16, %v1975_v37 }
 0x35b   :  { %2479 = vrot.lane.b32.xlu0 %v2467_v38, %s4276_s20 }
 0x35c   :  { %v1993_v42 = vadd.f32 %v1991_v24, %v1983_v41  ;;  %v2456_v43 = vpop.permute.xlu0 %2455  ;;  %v1994_v45 = vadd.f32 %v1991_v24, %v1984_v40  ;;  %v1996_v47 = vadd.f32 %v1991_v24, %v1986_v39  ;;  %v1995_v53 = vadd.f32 %v1991_v24, %v1985_v44 }
 0x35d   :  { %v2460_v21 = vsel %vm496_vm2, %v2454_v36, %v2456_v43  ;;  %v2461_v1 = vsel %vm496_vm2, %v2456_v43, %v2458_v48 }
 0x35e   :  { %v4783_v46 = vmax.f32 %v1993_v42, 0.0  ;;  %v4786_v54 = vmax.f32 %v1994_v45, 0.0  ;;  %v4789_v57 = vmax.f32 %v1996_v47, 0.0  ;;  %v4794_v61 = vmax.f32 %v1995_v53, 0.0 }
 0x360   :  { %v2665_v49 = vpop.permute.xlu0 %2664  ;;  %v2091_v56 = vmul.f32 %v2082_v51, %v4783_v46  ;;  %v2092_v62 = vmul.f32 %v2083_v60, %v4786_v54  ;;  %v2094_v63 = vmul.f32 %v2081_v25, %v4789_v57  ;;  %v2093_v7 = vmul.f32 %v2084_v0, %v4794_v61  ;;  %v3066_v25 = vpop.permute.xlu1 %3065 }
 0x361   :  { %v2680_v52 = vmul.f32 0.0, %v2665_v49  ;;  %v2052_v8 = vmul.f32 %v2043_v2, %v4786_v54  ;;  %v2051_v14 = vmul.f32 %v2042_v11, %v4783_v46  ;;  %v2053_v15 = vmul.f32 %v2044_v13, %v4794_v61 }
 0x362   :  { %2104 = vrot.lane.b32.xlu0 %v2091_v56, %s4277_s24  ;;  %v2468_v19 = vmul.f32 %v2459_v18, %v4783_v46  ;;  %v2054_v20 = vmul.f32 %v2041_v31, %v4789_v57  ;;  %v2469_v22 = vmul.f32 %v2460_v21, %v4786_v54  ;;  %v2471_v24 = vmul.f32 %v2458_v48, %v4789_v57 }
 0x363   :  { %2692 = vrot.lane.b32.xlu1 %v2680_v52, %s4275_s17  ;;  %v2470_v27 = vmul.f32 %v2461_v1, %v4794_v61  ;;  %v2672_v29 = vsel %vm712_vm3, %v2665_v49, %v2667_v59  ;;  %v3079_v12 = vmul.f32 0.0, %v3066_v25  ;;  %v2684_v34 = vmul.f32 %v2671_v10, %v4789_v57 }
 0x364   :  { %v2669_v9 = vpop.permute.xlu0 %2668  ;;  %v3275_v31 = vpop.permute.xlu1 %3274  ;;  %v2681_v50 = vmul.f32 %v2672_v29, %v4783_v46 }
 0x365   :  { %v2673_v26 = vsel %vm712_vm3, %v2667_v59, %v2669_v9  ;;  %v2674_v55 = vsel %vm712_vm3, %v2669_v9, %v2671_v10 }
 0x366   :  { %2110 = vrot.lane.b32.xlu0 %v2094_v63, %s4277_s24  ;;  %v2682_v28 = vmul.f32 %v2673_v26, %v4786_v54  ;;  %v2683_v32 = vmul.f32 %v2674_v55, %v4794_v61 }
 0x367   :  { %2106 = vrot.lane.b32.xlu1 %v2092_v62, %s4277_s24 }
 0x368   :  { %v3060_v16 = vpop.permute.xlu0 %3059  ;;  %v3279_v35 = vpop.permute.xlu1 %3278 }
 0x369   :  { %v3067_v36 = vsel %vm743_vm4, %v3060_v16, %v3062_v17  ;;  %v3292_v37 = vmul.f32 0.0, %v3279_v35  ;;  %v3075_v41 = vmul.f32 %v3060_v16, %v4783_v46 }
 0x36a   :  { %2274 = vrot.lane.b32.xlu0 %v2052_v8, %s4278_s28  ;;  %v3076_v38 = vmul.f32 %v3067_v36, %v4786_v54 }
 0x36b   :  { %2108 = vrot.lane.b32.xlu1 %v2093_v7, %s4277_s24 }
 0x36c   :  { %v3064_v23 = vpop.permute.xlu0 %3063  ;;  %v3488_v45 = vpop.permute.xlu1 %3487 }
 0x36d   :  { %v3068_v39 = vsel %vm743_vm4, %v3062_v17, %v3064_v23  ;;  %v3069_v43 = vsel %vm743_vm4, %v3064_v23, %v3066_v25  ;;  %v3893_v25 = vld [vmem:[%s5037_s7] sm:$0xff] }
 0x36e   :  { %2276 = vrot.lane.b32.xlu0 %v2053_v15, %s4278_s28  ;;  %v3077_v42 = vmul.f32 %v3068_v39, %v4794_v61  ;;  %v3078_v47 = vmul.f32 %v3069_v43, %v4789_v57  ;;  %v2055_v39 = vld [vmem:[%s5038_s6] sm:$0xff] }
 0x36f   :  { %2272 = vrot.lane.b32.xlu1 %v2051_v14, %s4278_s28 }
 0x370   :  { %v3273_v30 = vpop.permute.xlu0 %3272  ;;  %v3492_v52 = vpop.permute.xlu1 %3491 }
 0x371   :  { %v3280_v51 = vsel %vm527_vm5, %v3273_v30, %v3275_v31  ;;  %v3288_v63 = vmul.f32 %v3273_v30, %v4783_v46  ;;  %v3505_v13 = vmul.f32 0.0, %v3492_v52 }
 0x372   :  { %2481 = vrot.lane.b32.xlu0 %v2468_v19, %s4276_s20  ;;  %v3289_v56 = vmul.f32 %v3280_v51, %v4786_v54  ;;  %v4169_v51 = vld [vmem:[%s5031_s1 + $0x10] sm:$0xf] }
 0x373   :  { %2278 = vrot.lane.b32.xlu1 %v2054_v20, %s4278_s28 }
 0x374   :  { %v3277_v33 = vpop.permute.xlu0 %3276  ;;  %v3699_v7 = vpop.permute.xlu1 %3698 }
 0x375   :  { %v3281_v44 = vsel %vm527_vm5, %v3275_v31, %v3277_v33  ;;  %v3282_v53 = vsel %vm527_vm5, %v3277_v33, %v3279_v35  ;;  %v4156_v31 = vld [vmem:[%s5038_s6 + $0x8] sm:$0xff] }
 0x376   :  { %2487 = vrot.lane.b32.xlu0 %v2471_v24, %s4276_s20  ;;  %v3290_v48 = vmul.f32 %v3281_v44, %v4794_v61  ;;  %v3291_v59 = vmul.f32 %v3282_v53, %v4789_v57 }
 0x377   :  { %2483 = vrot.lane.b32.xlu1 %v2469_v22, %s4276_s20  ;;  %v3714_v22 = vmul.f32 %v3699_v7, %v4783_v46 }
 0x378   :  { %v3486_v40 = vpop.permute.xlu0 %3485  ;;  %v3703_v14 = vpop.permute.xlu1 %3702 }
 0x379   :  { %v3493_v60 = vsel %vm145_vm6, %v3486_v40, %v3488_v45  ;;  %v3501_v8 = vmul.f32 %v3486_v40, %v4783_v46 }
 0x37a   :  { %2696 = vrot.lane.b32.xlu0 %v2682_v28, %s4275_s17  ;;  %v3502_v0 = vmul.f32 %v3493_v60, %v4786_v54  ;;  %v2868_v60 = vrot.slane %v4169_v51, %v4355_v6 }
 0x37b   :  { %2485 = vrot.lane.b32.xlu1 %v2470_v27, %s4276_s20 }
 0x37c   :  { %v3490_v49 = vpop.permute.xlu0 %3489  ;;  %v2882_v6 = vmul.f32 %v2868_v60, %v4786_v54 }
 0x37d   :  { %v3494_v2 = vsel %vm145_vm6, %v3488_v45, %v3490_v49  ;;  %v3495_v11 = vsel %vm145_vm6, %v3490_v49, %v3492_v52 }
 0x37e   :  { %2698 = vrot.lane.b32.xlu0 %v2683_v32, %s4275_s17  ;;  %v3503_v9 = vmul.f32 %v3494_v2, %v4794_v61  ;;  %v3504_v15 = vmul.f32 %v3495_v11, %v4789_v57 }
 0x37f   :  { %2694 = vrot.lane.b32.xlu1 %v2681_v50, %s4275_s17 }
 0x380   :  { %v2103_v62 = vpop.permute.xlu0 %2102 }
 0x382   :  { %3095 = vrot.lane.b32.xlu0 %v3079_v12, %s4274_s14 }
 0x383   :  { %2700 = vrot.lane.b32.xlu1 %v2684_v34, %s4275_s17 }
 0x384   :  { %v3701_v10 = vpop.permute.xlu0 %3700 }
 0x385   :  { %v3706_v16 = vsel %vm315_vm7, %v3699_v7, %v3701_v10  ;;  %v3707_v17 = vsel %vm315_vm7, %v3701_v10, %v3703_v14  ;;  %v2872_v10 = vrot.slane %v4169_v51, %v4349_v3 }
 0x386   :  { %3089 = vrot.lane.b32.xlu0 %v3076_v38, %s4274_s14  ;;  %v3715_v19 = vmul.f32 %v3706_v16, %v4786_v54  ;;  %v3716_v20 = vmul.f32 %v3707_v17, %v4794_v61  ;;  %v4170_v16 = vld [vmem:[%s5038_s6 + $0x20] sm:$0xff] }
 0x387   :  { %3308 = vrot.lane.b32.xlu1 %v3292_v37, %s4273_s29 }
 0x388   :  { %v3705_v18 = vpop.permute.xlu0 %3704 }
 0x389   :  { %v3708_v21 = vsel %vm315_vm7, %v3703_v14, %v3705_v18  ;;  %v3718_v24 = vmul.f32 0.0, %v3705_v18 }
 0x38a   :  { %3087 = vrot.lane.b32.xlu0 %v3075_v41, %s4274_s14  ;;  %v3717_v23 = vmul.f32 %v3708_v21, %v4789_v57 }
 0x38b   :  { %3091 = vrot.lane.b32.xlu1 %v3077_v42, %s4274_s14 }
 0x38e   :  { %3304 = vrot.lane.b32.xlu0 %v3290_v48, %s4273_s29  ;;  %v4162_v48 = vld [vmem:[%s5038_s6 + $0x10] sm:$0xff] }
 0x38f   :  { %3093 = vrot.lane.b32.xlu1 %v3078_v47, %s4274_s14 }
 0x392   :  { %3306 = vrot.lane.b32.xlu0 %v3291_v59, %s4273_s29 }
 0x393   :  { %3302 = vrot.lane.b32.xlu1 %v3289_v56, %s4273_s29 }
 0x396   :  { %3515 = vrot.lane.b32.xlu0 %v3502_v0, %s4271_s23 }
 0x397   :  { %3300 = vrot.lane.b32.xlu1 %v3288_v63, %s4273_s29 }
 0x39a   :  { %3513 = vrot.lane.b32.xlu0 %v3501_v8, %s4271_s23  ;;  %v4166_v8 = vld [vmem:[%s5038_s6 + $0x18] sm:$0xff] }
 0x39b   :  { %3517 = vrot.lane.b32.xlu1 %v3503_v9, %s4271_s23  ;;  %v2876_v9 = vrot.slane %v4169_v51, %v4353_v5 }
 0x39d   :  { %v2884_v5 = vmul.f32 %v2876_v9, %v4789_v57 }
 0x39e   :  { %3521 = vrot.lane.b32.xlu0 %v3505_v13, %s4271_s23 }
 0x39f   :  { %3519 = vrot.lane.b32.xlu1 %v3504_v15, %s4271_s23 }
 0x3a2   :  { %3730 = vrot.lane.b32.xlu0 %v3716_v20, %s4272_s26 }
 0x3a3   :  { %3728 = vrot.lane.b32.xlu1 %v3715_v19, %s4272_s26 }
 0x3a6   :  { %3732 = vrot.lane.b32.xlu0 %v3717_v23, %s4272_s26  ;;  %v4174_v23 = vld [vmem:[%s5038_s6 + $0x28] sm:$0xff] }
 0x3a7   :  { %3726 = vrot.lane.b32.xlu1 %v3714_v22, %s4272_s26 }
 0x3aa   :  { %3896 = vperm.xlu0 %4265, %v3893_v25  }
 0x3ab   :  { %3734 = vrot.lane.b32.xlu1 %v3718_v24, %s4272_s26 }
 0x3c5   :  { %v2271_v26 = vpop.permute.xlu1 %2270 }
 0x3cd   :  { %v2480_v1 = vpop.permute.xlu0 %2479 }
 0x3d4   :  { %v2105_v27 = vpop.permute.xlu0 %2104 }
 0x3d5   :  { %v2693_v28 = vpop.permute.xlu1 %2692  ;;  %v2112_v50 = vsel %vm145_vm6, %v2103_v62, %v2105_v27  ;;  %v2864_v62 = vrot.slane %v4169_v51, %v4351_v4  ;;  %v3952_v51 = vld [vmem:[%s5032_s0 + $0x20] sm:$0xff] }
 0x3d7   :  { %v2881_v4 = vmul.f32 %v2864_v62, %v4783_v46  ;;  %v2883_v46 = vmul.f32 %v2872_v10, %v4794_v61 }
 0x3d8   :  { %v2111_v29 = vpop.permute.xlu0 %2110 }
 0x3d9   :  { %v2107_v55 = vpop.permute.xlu1 %2106 }
 0x3da   :  { %v2113_v30 = vsel %vm145_vm6, %v2105_v27, %v2107_v55 }
 0x3db   :  { %2123 = vmatprep.subr.mxu0 %v2113_v30  ;;  %v4178_v30 = vld [vmem:[%s5038_s6 + $0x30] sm:$0xff] }
 0x3dc   :  { %2124 = vmatpush1.msra.mxu0 %v2112_v50  ;;  %v2275_v32 = vpop.permute.xlu0 %2274 }
 0x3dd   :  { %4157 = vmatmul.mubr.msk.f32.vlgmr.msra.gmra.mrb[2].mxu0 %vm154_vm8, %v4156_v31  ;;  %v2109_v12 = vpop.permute.xlu1 %2108 }
 0x3de   :  { %v2114_v33 = vsel %vm145_vm6, %v2107_v55, %v2109_v12  ;;  %v2115_v34 = vsel %vm145_vm6, %v2109_v12, %v2111_v29  ;;  %2355 = vmatprep.mubr.f32.mxu0 %v4279_v58 }
 0x3df   :  { %2194 = vmatprep.subr.mxu1 %v2115_v34 }
 0x3e0   :  { %2195 = vmatpush1.msra.mxu1 %v2114_v33  ;;  %v2277_v35 = vpop.permute.xlu0 %2276 }
 0x3e1   :  { %4158 = vmatmul.mubr.msk.f32.vlgmr.msra.gmra.mrb[2].mxu1 %vm154_vm8, %v4156_v31  ;;  %v2273_v36 = vpop.permute.xlu1 %2272  ;;  %v2282_v43 = vsel %vm315_vm7, %v2275_v32, %v2277_v35 }
 0x3e2   :  { %v2280_v37 = vsel %vm315_vm7, %v2271_v26, %v2273_v36  ;;  %v2281_v38 = vsel %vm315_vm7, %v2273_v36, %v2275_v32  ;;  %2426 = vmatprep.mubr.f32.mxu1 %v4279_v58 }
 0x3e3   :  { %2291 = vmatprep.subr.mxu0 %v2281_v38 }
 0x3e4   :  { %2292 = vmatpush1.msra.mxu0 %v2280_v37  ;;  %v2482_v40 = vpop.permute.xlu0 %2481  ;;  %v4182_v37 = vld [vmem:[%s5038_s6 + $0x38] sm:$0xff] }
 0x3e5   :  { %4159 = vmatmul.mubr.msk.f32.vlgmr.msra.gmra.mrb[2].mxu0 %vm154_vm8, %v2055_v39  ;;  %v2279_v41 = vpop.permute.xlu1 %2278  ;;  %v2489_v49 = vsel %vm527_vm5, %v2480_v1, %v2482_v40 }
 0x3e6   :  { %v2283_v42 = vsel %vm315_vm7, %v2277_v35, %v2279_v41  ;;  %2564 = vmatprep.mubr.f32.mxu0 %v4279_v58 }
 0x3e7   :  { %2362 = vmatprep.subr.mxu1 %v2283_v42  ;;  %v3950_v42 = vld [vmem:[%s5032_s0 + $0x10] sm:$0xff] }
 0x3e8   :  { %2363 = vmatpush1.msra.mxu1 %v2282_v43  ;;  %v2488_v44 = vpop.permute.xlu0 %2487 }
 0x3e9   :  { %4160 = vmatmul.mubr.msk.f32.vlgmr.msra.gmra.mrb[2].mxu1 %vm154_vm8, %v2055_v39  ;;  %v2484_v45 = vpop.permute.xlu1 %2483 }
 0x3ea   :  { %v2490_v47 = vsel %vm527_vm5, %v2482_v40, %v2484_v45  ;;  %2635 = vmatprep.mubr.f32.mxu1 %v4279_v58 }
 0x3eb   :  { %2500 = vmatprep.subr.mxu0 %v2490_v47 }
 0x3ec   :  { %2501 = vmatpush1.msra.mxu0 %v2489_v49  ;;  %v2697_v53 = vpop.permute.xlu0 %2696 }
 0x3ed   :  { %4163 = vmatmul.mubr.msk.f32.vlgmr.msra.gmra.mrb[2].mxu0 %vm154_vm8, %v4162_v48  ;;  %v2486_v52 = vpop.permute.xlu1 %2485 }
 0x3ee   :  { %v2491_v56 = vsel %vm527_vm5, %v2484_v45, %v2486_v52  ;;  %v2492_v59 = vsel %vm527_vm5, %v2486_v52, %v2488_v44  ;;  %2777 = vmatprep.mubr.f32.mxu0 %v4279_v58  ;;  %v4186_v44 = vld [vmem:[%s5038_s6 + $0x40] sm:$0xff]  ;;  %v3949_v45 = vld [vmem:[%s5032_s0 + $0x8] sm:$0xff]  ;;  %v3951_v52 = vld [vmem:[%s5032_s0 + $0x18] sm:$0xff] }
 0x3ef   :  { %2571 = vmatprep.subr.mxu1 %v2492_v59 }
 0x3f0   :  { %2572 = vmatpush1.msra.mxu1 %v2491_v56  ;;  %v2699_v63 = vpop.permute.xlu0 %2698  ;;  %v3953_v56 = vld [vmem:[%s5039_s10] sm:$0xff] }
 0x3f1   :  { %4164 = vmatmul.mubr.msk.f32.vlgmr.msra.gmra.mrb[2].mxu1 %vm154_vm8, %v4162_v48  ;;  %v2695_v0 = vpop.permute.xlu1 %2694  ;;  %v2704_v15 = vsel %vm743_vm4, %v2697_v53, %v2699_v63 }
 0x3f2   :  { %v2702_v2 = vsel %vm743_vm4, %v2693_v28, %v2695_v0  ;;  %v2703_v7 = vsel %vm743_vm4, %v2695_v0, %v2697_v53  ;;  %2848 = vmatprep.mubr.f32.mxu1 %v4279_v58 }
 0x3f3   :  { %2713 = vmatprep.subr.mxu0 %v2703_v7 }
 0x3f4   :  { %2714 = vmatpush1.msra.mxu0 %v2702_v2  ;;  %v3096_v11 = vpop.permute.xlu0 %3095 }
 0x3f5   :  { %4167 = vmatmul.mubr.msk.f32.vlgmr.msra.gmra.mrb[2].mxu0 %vm154_vm8, %v4166_v8  ;;  %2890 = vmatprep.subr.mxu0 %v2882_v6  ;;  %v2701_v13 = vpop.permute.xlu1 %2700 }
 0x3f6   :  { %2891 = vmatpush1.msra.mxu0 %v2881_v4  ;;  %v2705_v14 = vsel %vm743_vm4, %v2699_v63, %v2701_v13  ;;  %2954 = vmatprep.mubr.f32.mxu0 %v4279_v58 }
 0x3f7   :  { %2784 = vmatprep.subr.mxu1 %v2705_v14  ;;  %v3954_v14 = vld [vmem:[%s5041_s11] sm:$0xff] }
 0x3f8   :  { %2785 = vmatpush1.msra.mxu1 %v2704_v15  ;;  %v3090_v54 = vpop.permute.xlu0 %3089 }
 0x3f9   :  { %4168 = vmatmul.mubr.msk.f32.vlgmr.msra.gmra.mrb[2].mxu1 %vm154_vm8, %v4166_v8  ;;  %2961 = vmatprep.subr.mxu1 %v2884_v5  ;;  %v3309_v3 = vpop.permute.xlu1 %3308 }
 0x3fa   :  { %2962 = vmatpush1.msra.mxu1 %v2883_v46  ;;  %3025 = vmatprep.mubr.f32.mxu1 %v4279_v58 }
 0x3fc   :  { %v3088_v17 = vpop.permute.xlu0 %3087 }
 0x3fd   :  { %4171 = vmatmul.mubr.msk.f32.vlgmr.msra.gmra.mrb[2].mxu0 %vm154_vm8, %v4170_v16  ;;  %v3092_v18 = vpop.permute.xlu1 %3091  ;;  %v3097_v61 = vsel %vm712_vm3, %v3088_v17, %v3090_v54 }
 0x3fe   :  { %v3098_v57 = vsel %vm712_vm3, %v3090_v54, %v3092_v18  ;;  %3172 = vmatprep.mubr.f32.mxu0 %v4279_v58 }
 0x3ff   :  { %3108 = vmatprep.subr.mxu0 %v3098_v57 }
 0x400   :  { %3109 = vmatpush1.msra.mxu0 %v3097_v61  ;;  %v3305_v19 = vpop.permute.xlu0 %3304 }
 0x401   :  { %4172 = vmatmul.mubr.msk.f32.vlgmr.msra.gmra.mrb[2].mxu1 %vm154_vm8, %v4170_v16  ;;  %v3094_v20 = vpop.permute.xlu1 %3093 }
 0x402   :  { %v3099_v21 = vsel %vm712_vm3, %v3092_v18, %v3094_v20  ;;  %v3100_v22 = vsel %vm712_vm3, %v3094_v20, %v3096_v11  ;;  %3243 = vmatprep.mubr.f32.mxu1 %v4279_v58 }
 0x403   :  { %3179 = vmatprep.subr.mxu1 %v3100_v22 }
 0x404   :  { %3180 = vmatpush1.msra.mxu1 %v3099_v21  ;;  %v3307_v24 = vpop.permute.xlu0 %3306 }
 0x405   :  { %4175 = vmatmul.mubr.msk.f32.vlgmr.msra.gmra.mrb[2].mxu0 %vm154_vm8, %v4174_v23  ;;  %v3303_v25 = vpop.permute.xlu1 %3302  ;;  %v3313_v26 = vsel %vm496_vm2, %v3307_v24, %v3309_v3  ;;  %v3312_v27 = vsel %vm496_vm2, %v3305_v19, %v3307_v24  ;;  %v3929_v24 = vld [vmem:[%s5042_s8] sm:$0xff] }
 0x406   :  { %v3311_v1 = vsel %vm496_vm2, %v3303_v25, %v3305_v19  ;;  %3385 = vmatprep.mubr.f32.mxu0 %v4279_v58  ;;  %3392 = vmatprep.subr.mxu1 %v3313_v26 }
 0x407   :  { %3321 = vmatprep.subr.mxu0 %v3311_v1 }
 0x408   :  { %v3516_v28 = vpop.permute.xlu0 %3515 }
 0x409   :  { %4176 = vmatmul.mubr.msk.f32.vlgmr.msra.gmra.mrb[2].mxu1 %vm154_vm8, %v4174_v23  ;;  %v3301_v29 = vpop.permute.xlu1 %3300 }
 0x40a   :  { %3393 = vmatpush1.msra.mxu1 %v3312_v27  ;;  %v3310_v55 = vsel %vm496_vm2, %v3301_v29, %v3303_v25  ;;  %3456 = vmatprep.mubr.f32.mxu1 %v4279_v58 }
 0x40b   :  { %3322 = vmatpush1.msra.mxu0 %v3310_v55 }
 0x40c   :  { %v3514_v31 = vpop.permute.xlu0 %3513 }
 0x40d   :  { %4179 = vmatmul.mubr.msk.f32.vlgmr.msra.gmra.mrb[2].mxu0 %vm154_vm8, %v4178_v30  ;;  %v3518_v50 = vpop.permute.xlu1 %3517  ;;  %v3523_v12 = vsel %vm114_vm0, %v3514_v31, %v3516_v28 }
 0x40e   :  { %v3524_v32 = vsel %vm114_vm0, %v3516_v28, %v3518_v50  ;;  %3598 = vmatprep.mubr.f32.mxu0 %v4279_v58 }
 0x40f   :  { %3534 = vmatprep.subr.mxu0 %v3524_v32 }
 0x410   :  { %3535 = vmatpush1.msra.mxu0 %v3523_v12  ;;  %v3522_v33 = vpop.permute.xlu0 %3521 }
 0x411   :  { %4180 = vmatmul.mubr.msk.f32.vlgmr.msra.gmra.mrb[2].mxu1 %vm154_vm8, %v4178_v30  ;;  %v3520_v34 = vpop.permute.xlu1 %3519 }
 0x412   :  { %v3525_v35 = vsel %vm114_vm0, %v3518_v50, %v3520_v34  ;;  %v3526_v36 = vsel %vm114_vm0, %v3520_v34, %v3522_v33  ;;  %3669 = vmatprep.mubr.f32.mxu1 %v4279_v58 }
 0x413   :  { %3605 = vmatprep.subr.mxu1 %v3526_v36 }
 0x414   :  { %3606 = vmatpush1.msra.mxu1 %v3525_v35  ;;  %v3731_v38 = vpop.permute.xlu0 %3730 }
 0x415   :  { %4183 = vmatmul.mubr.msk.f32.vlgmr.msra.gmra.mrb[2].mxu0 %vm154_vm8, %v4182_v37  ;;  %v3729_v39 = vpop.permute.xlu1 %3728 }
 0x416   :  { %v3737_v40 = vsel %vm72_vm1, %v3729_v39, %v3731_v38  ;;  %3811 = vmatprep.mubr.f32.mxu0 %v4279_v58 }
 0x417   :  { %3747 = vmatprep.subr.mxu0 %v3737_v40 }
 0x418   :  { %v3733_v47 = vpop.permute.xlu0 %3732 }
 0x419   :  { %4184 = vmatmul.mubr.msk.f32.vlgmr.msra.gmra.mrb[2].mxu1 %vm154_vm8, %v4182_v37  ;;  %v3727_v41 = vpop.permute.xlu1 %3726  ;;  %v3738_v53 = vsel %vm72_vm1, %v3731_v38, %v3733_v47 }
 0x41a   :  { %v3736_v43 = vsel %vm72_vm1, %v3727_v41, %v3729_v39  ;;  %3882 = vmatprep.mubr.f32.mxu1 %v4279_v58 }
 0x41b   :  { %3748 = vmatpush1.msra.mxu0 %v3736_v43 }
 0x41c   :  { %3963 = vmatprep.subr.mxu0 %v3950_v42 }
 0x41d   :  { %4187 = vmatmul.mubr.msk.f32.vlgmr.msra.gmra.mrb[2].mxu0 %vm154_vm8, %v4186_v44  ;;  %v3735_v48 = vpop.permute.xlu1 %3734 }
 0x41e   :  { %v3739_v49 = vsel %vm72_vm1, %v3733_v47, %v3735_v48  ;;  %3964 = vmatpush1.msra.mxu0 %v3949_v45  ;;  %4027 = vmatprep.mubr.f32.mxu0 %v4279_v58 }
 0x41f   :  { %3818 = vmatprep.subr.mxu1 %v3739_v49 }
 0x420   :  { %3819 = vmatpush1.msra.mxu1 %v3738_v53 }
 0x421   :  { %4188 = vmatmul.mubr.msk.f32.vlgmr.msra.gmra.mrb[2].mxu1 %vm154_vm8, %v4186_v44  ;;  %4034 = vmatprep.subr.mxu1 %v3952_v51 }
 0x422   :  { %4035 = vmatpush1.msra.mxu1 %v3951_v52  ;;  %4098 = vmatprep.mubr.f32.mxu1 %v4279_v58  ;;  %v3939_v58 = vld [vmem:[%s5040_s9] sm:$0xff] }
 0x423   :  { %4189 = vmatmul.mubr.msk.f32.vlgmr.msra.gmra.mrb[4].mxu0 %vm154_vm8, %v3953_v56 }
 0x425   :  { %4190 = vmatmul.mubr.msk.f32.vlgmr.msra.gmra.mrb[4].mxu1 %vm154_vm8, %v3953_v56 }
 0x429   :  { %v3897_v59 = vpop.permute.xlu0 %3896 }
 0x4f0   :  { %v3813_v60 = vpop.f32.mrb[2].mxu0 }
 0x4f1   :  { %v3899_v62 = vadd.f32 %v3897_v59, %v3813_v60  ;;  %v3815_v63 = vpop.f32.mrb[3].mxu0 }
 0x4f2   :  { %v3900_v0 = vadd.f32 %v3897_v59, %v3815_v63 }
 0x4f4   :  { %v3903_v2 = vadd.f32 %v3900_v0, %v3899_v62  ;;  %v3884_v7 = vpop.f32.mrb[2].mxu1 }
 0x4f5   :  { %v3901_v8 = vadd.f32 %v3897_v59, %v3884_v7  ;;  %v3886_v6 = vpop.f32.mrb[3].mxu1 }
 0x4f6   :  { %v3902_v9 = vadd.f32 %v3897_v59, %v3886_v6  ;;  %v4029_v11 = vpop.f32.mrb[4].mxu0 }
 0x4f7   :  { %v3904_v4 = vadd.f32 %v3903_v2, %v3901_v8  ;;  %v4031_v15 = vpop.f32.mrb[5].mxu0 }
 0x4f8   :  { %v4100_v13 = vpop.f32.mrb[4].mxu1 }
 0x4f9   :  { %v3905_v10 = vadd.f32 %v3904_v4, %v3902_v9  ;;  %v4102_v5 = vpop.f32.mrb[5].mxu1 }
 0x4fb   :  { %3906 = vadd.xlane.f32.xlu1 %v3905_v10 }
 0x50c   :  { %3942 = vperm.xlu1 %4266, %v3939_v58  }
 0x510   :  { %3957 = vperm.xlu1 %4266, %v3954_v14  }
 0x588   :  { %v3907_v46 = vpop.xlane.xlu1 %3906 }
 0x589   :  { %v3908_v54 = vmul.f32 0.001953125, %v3907_v46 }
 0x58b   :  { %v3909_v3 = vsub.f32 %v3899_v62, %v3908_v54  ;;  %v3910_v16 = vsub.f32 %v3900_v0, %v3908_v54  ;;  %v3911_v17 = vsub.f32 %v3901_v8, %v3908_v54  ;;  %v3912_v61 = vsub.f32 %v3902_v9, %v3908_v54 }
 0x58c   :  { %v3943_v27 = vpop.permute.xlu1 %3942 }
 0x58d   :  { %v3913_v18 = vmul.f32 %v3909_v3, %v3909_v3  ;;  %v3914_v57 = vmul.f32 %v3910_v16, %v3910_v16  ;;  %v3915_v20 = vmul.f32 %v3911_v17, %v3911_v17  ;;  %v3916_v21 = vmul.f32 %v3912_v61, %v3912_v61 }
 0x58f   :  { %v3917_v19 = vadd.f32 %v3914_v57, %v3913_v18 }
 0x590   :  { %v3958_v29 = vpop.permute.xlu1 %3957 }
 0x591   :  { %v3918_v22 = vadd.f32 %v3917_v19, %v3915_v20  ;;  %v4030_v36 = vadd.f32 %v4029_v11, %v3958_v29  ;;  %v4032_v37 = vadd.f32 %v4031_v15, %v3958_v29  ;;  %v4101_v38 = vadd.f32 %v4100_v13, %v3958_v29 }
 0x592   :  { %v4103_v39 = vadd.f32 %v4102_v5, %v3958_v29 }
 0x593   :  { %v3919_v23 = vadd.f32 %v3918_v22, %v3916_v21 }
 0x595   :  { %3920 = vadd.xlane.f32.xlu0 %v3919_v23 }
 0x5ab   :  { %3932 = vperm.xlu0 %4265, %v3929_v24  }
 0x622   :  { %v3921_v25 = vpop.xlane.xlu0 %3920 }
 0x623   :  { %v3922_v26 = vmul.f32 0.001953125, %v3921_v25 }
 0x625   :  { %v3923_v1 = vadd.f32 1e-05, %v3922_v26 }
 0x627   :  { %4269 = vrsqrt.f32 %v3923_v1 }
 0x62a   :  { %v3933_v32 = vpop.permute.xlu0 %3932 }
 0x631   :  { %v4270_v28 = vpop.eup %4269 }
 0x632   :  { %v3925_v55 = vmul.f32 %v4270_v28, %v3909_v3  ;;  %v3926_v30 = vmul.f32 %v4270_v28, %v3910_v16  ;;  %v3927_v31 = vmul.f32 %v4270_v28, %v3911_v17  ;;  %v3928_v50 = vmul.f32 %v4270_v28, %v3912_v61 }
 0x634   :  { %v3935_v12 = vmul.f32 %v3933_v32, %v3925_v55  ;;  %v3936_v33 = vmul.f32 %v3933_v32, %v3926_v30  ;;  %v3937_v34 = vmul.f32 %v3933_v32, %v3927_v31  ;;  %v3938_v35 = vmul.f32 %v3933_v32, %v3928_v50 }
 0x636   :  { %v3945_v40 = vadd.f32 %v3943_v27, %v3935_v12  ;;  %v3946_v41 = vadd.f32 %v3943_v27, %v3936_v33  ;;  %v3947_v42 = vadd.f32 %v3943_v27, %v3937_v34  ;;  %v3948_v43 = vadd.f32 %v3943_v27, %v3938_v35 }
 0x638   :  { %v4105_v44 = vadd.f32 %v4030_v36, %v3945_v40  ;;  %v4106_v45 = vadd.f32 %v4032_v37, %v3946_v41  ;;  %v4107_v47 = vadd.f32 %v4101_v38, %v3947_v42  ;;  %v4108_v48 = vadd.f32 %v4103_v39, %v3948_v43 }
 0x63a   :  { %v4109_v49 = vmax.f32 %v4105_v44, 0.0  ;;  %v4110_v51 = vmax.f32 %v4106_v45, 0.0  ;;  %v4111_v53 = vmax.f32 %v4107_v47, 0.0  ;;  %v4112_v52 = vmax.f32 %v4108_v48, 0.0 }
 0x63c   :  { %4113 = vst [vmem:[%s5043_s12] sm:$0xff] %v4109_v49  ;;  %4114 = vst [vmem:[%s5043_s12 + $0x8] sm:$0xff] %v4110_v51 }
 0x63d   :  { %4115 = vst [vmem:[%s5043_s12 + $0x10] sm:$0xff] %v4111_v53  ;;  %4116 = vst [vmem:[%s5043_s12 + $0x18] sm:$0xff] %v4112_v52 }

</bundles_post_ra>
